<compile_context>
chip_gen: v5e
topology: v5e:2x2
jax: 0.10.0
libtpu: 0.0.40
codegen_flags: <defaults>
</compile_context>

<pallas_src>
import functools

import jax
import jax.numpy as jnp
from jax.experimental import pallas as pl
from jax.experimental.pallas import tpu as pltpu

IN_DIM = 1024
HID1 = 512
HID2 = 256
LANE = 128


def _round_up(x, m):
    return (x + m - 1) // m * m


def _instance_da_kernel(x_ref, w1_ref, b1_ref, w23_ref, b23_ref, out_ref):
    # Layer 1: Linear(1024 -> 512) + ReLU. bf16 x bf16 -> f32 MXU matmul.
    h1 = jnp.dot(x_ref[...], w1_ref[...], preferred_element_type=jnp.float32)
    h1 = jnp.maximum(h1 + b1_ref[...], 0.0)

    # Folded tail: Linear(512 -> 256) followed by Linear(256 -> num_domains)
    # with no nonlinearity in between == single affine map 512 -> num_domains
    # (weights folded once in the wrapper, padded to a lane-dense width).
    logits = jnp.dot(h1.astype(w23_ref.dtype), w23_ref[...],
                     preferred_element_type=jnp.float32) + b23_ref[...]

    out_ref[...] = jax.nn.sigmoid(logits).astype(out_ref.dtype)


@functools.partial(jax.jit, static_argnames=("block_m", "compute_dtype"))
def instance_da_forward(x, w1, b1, w2, b2, w3, b3, *, block_m=512,
                        compute_dtype=jnp.bfloat16):
    # grad_reverse is identity in the forward pass.
    # TODO(synk): GRLayer's gradient-reversal backward (grad * -0.1) is not
    # implemented (forward-only kernel).
    n, d = x.shape
    assert d == IN_DIM
    num_domains = w3.shape[1]
    out_dtype = x.dtype

    # --- one-time wrapper-side precompute (f32) -----------------------------
    # Fold W23 = W2 @ W3 and b23 = b2 @ W3 + b3.
    w23 = jnp.dot(w2.astype(jnp.float32), w3.astype(jnp.float32))
    b23 = jnp.dot(b2.astype(jnp.float32), w3.astype(jnp.float32)) + b3.astype(jnp.float32)

    # Pad the tiny output dimension up to a multiple of 128 lanes so that the
    # output stores are unmasked, lane-dense slabs.
    out_pad = _round_up(max(num_domains, 1), LANE)
    w23 = jnp.pad(w23, ((0, 0), (0, out_pad - num_domains)))
    b23 = jnp.pad(b23, ((0, 0), (0, out_pad - num_domains)))

    # MXU-native bf16 operands; accumulation stays f32 inside the kernel,
    # biases are added and sigmoid applied in f32.
    x_c = x.astype(compute_dtype)
    w1_c = w1.astype(compute_dtype)
    w23_c = w23.astype(compute_dtype)
    b1_f = b1.astype(jnp.float32)
    b23_f = b23.astype(jnp.float32)

    # --- batch tiling --------------------------------------------------------
    # Large M tiles amortize per-grid-step overhead; pad ragged batches.
    # VMEM at bm=512 / bf16: x tile 1 MiB (x2 buffers) + W1 1 MiB + folded W 128 KiB
    # + f32 h1/out scratch — a few MiB, well under the 32 MiB scoped default on
    # every generation (including v7x's 64 MiB physical VMEM).
    bm = min(block_m, _round_up(n, 8))
    n_pad = _round_up(n, bm)
    if n_pad != n:
        x_c = jnp.pad(x_c, ((0, n_pad - n), (0, 0)))
    grid = (n_pad // bm,)

    full = lambda shape: pl.BlockSpec(shape, lambda i: (0, 0))

    itemsize = jnp.dtype(compute_dtype).itemsize
    flops = 2 * n_pad * (IN_DIM * HID1 + HID1 * out_pad)
    bytes_accessed = (n_pad * IN_DIM * itemsize
                      + (IN_DIM * HID1 + HID1 * out_pad) * itemsize
                      + (HID1 + out_pad) * 4
                      + n_pad * out_pad * jnp.dtype(out_dtype).itemsize)

    out = pl.pallas_call(
        _instance_da_kernel,
        out_shape=jax.ShapeDtypeStruct((n_pad, out_pad), out_dtype),
        grid_spec=pltpu.PrefetchScalarGridSpec(
            num_scalar_prefetch=0,
            grid=grid,
            in_specs=[
                pl.BlockSpec((bm, IN_DIM), lambda i: (i, 0)),  # x tile
                full((IN_DIM, HID1)),                          # W1 (bf16)
                full((1, HID1)),                               # b1 (f32)
                full((HID1, out_pad)),                         # folded W2@W3 (bf16, padded)
                full((1, out_pad)),                            # folded bias (f32, padded)
            ],
            out_specs=pl.BlockSpec((bm, out_pad), lambda i: (i, 0)),
        ),
        compiler_params=pltpu.CompilerParams(
            dimension_semantics=("parallel",)),
        cost_estimate=pl.CostEstimate(
            flops=flops,
            transcendentals=n_pad * out_pad,
            bytes_accessed=bytes_accessed),
    )(x_c, w1_c, b1_f, w23_c, b23_f)

    return out[:n, :num_domains]


def init_linear_params(key, fan_in, fan_out):
    # Mimic PyTorch nn.Linear defaults: weight, bias ~ U(-1/sqrt(fan_in), 1/sqrt(fan_in)).
    kw, kb = jax.random.split(key)
    bound = 1.0 / jnp.sqrt(jnp.float32(fan_in))
    # Stored as (in, out) == PyTorch weight transposed.
    w = jax.random.uniform(kw, (fan_in, fan_out), jnp.float32, -bound, bound)
    b = jax.random.uniform(kb, (1, fan_out), jnp.float32, -bound, bound)
    return w, b


def reference_forward(x, w1, b1, w2, b2, w3, b3):
    h1 = jnp.maximum(x @ w1 + b1, 0.0)
    h2 = h1 @ w2 + b2
    return jax.nn.sigmoid(h2 @ w3 + b3)


if __name__ == "__main__":
    num_domains = 2
    batch = 16

    key = jax.random.PRNGKey(0)
    kx, k1, k2, k3 = jax.random.split(key, 4)

    x = jax.random.normal(kx, (batch, IN_DIM), jnp.float32)
    w1, b1 = init_linear_params(k1, IN_DIM, HID1)
    w2, b2 = init_linear_params(k2, HID1, HID2)
    w3, b3 = init_linear_params(k3, HID2, num_domains)

    out = instance_da_forward(x, w1, b1, w2, b2, w3, b3)
    out = jax.block_until_ready(out)

    ref = reference_forward(x, w1, b1, w2, b2, w3, b3)
    assert out.shape == (batch, num_domains)
    # bf16 matmul operands + folded tail: tolerance covers the rounding difference
    # vs. the pure-f32 unfolded reference (sigmoid outputs live in (0, 1)).
    assert jnp.allclose(out.astype(jnp.float32), ref, atol=1e-2, rtol=0.0)

    print("KERNEL_OK")
</pallas_src>

<mosaic_0001>
module attributes {stable_mosaic.version = 11 : i64} {
  func.func @_instance_da_kernel(%arg0: i32, %arg1: memref<16x1024xbf16, #tpu.memory_space<vmem>>, %arg2: memref<1024x512xbf16, #tpu.memory_space<vmem>>, %arg3: memref<1x512xf32, #tpu.memory_space<vmem>>, %arg4: memref<512x128xbf16, #tpu.memory_space<vmem>>, %arg5: memref<1x128xf32, #tpu.memory_space<vmem>>, %arg6: memref<16x128xf32, #tpu.memory_space<vmem>>) attributes {dimension_semantics = [#tpu.dimension_semantics<parallel>], iteration_bounds = array<i64: 1>, scalar_prefetch = 0 : i64, scratch_operands = 0 : i64, tpu.core_type = #tpu.core_type<tc>, window_params = [{transform_indices = @transform_0, window_bounds = array<i64: 16, 1024>}, {pipeline_mode = #tpu.pipeline_mode<synchronous>, transform_indices = @transform_1, window_bounds = array<i64: 1024, 512>}, {pipeline_mode = #tpu.pipeline_mode<synchronous>, transform_indices = @transform_2, window_bounds = array<i64: 1, 512>}, {pipeline_mode = #tpu.pipeline_mode<synchronous>, transform_indices = @transform_3, window_bounds = array<i64: 512, 128>}, {pipeline_mode = #tpu.pipeline_mode<synchronous>, transform_indices = @transform_4, window_bounds = array<i64: 1, 128>}, {transform_indices = @transform_5, window_bounds = array<i64: 16, 128>}]} {
    %c0 = arith.constant 0 : index
    %c0_0 = arith.constant 0 : index
    %0 = vector.load %arg1[%c0, %c0_0] : memref<16x1024xbf16, #tpu.memory_space<vmem>>, vector<16x1024xbf16>
    %c0_1 = arith.constant 0 : index
    %c0_2 = arith.constant 0 : index
    %1 = vector.load %arg2[%c0_1, %c0_2] : memref<1024x512xbf16, #tpu.memory_space<vmem>>, vector<1024x512xbf16>
    %cst = arith.constant dense<0.000000e+00> : vector<16x512xf32>
    %2 = tpu.matmul %0, %1, %cst {dimension_numbers = #tpu.dot_dimension_numbers<[1], [0], [0], [1], [0, 0, 1, 1], [], []>} : vector<16x1024xbf16>, vector<1024x512xbf16>, vector<16x512xf32> -> vector<16x512xf32>
    %c0_3 = arith.constant 0 : index
    %c0_4 = arith.constant 0 : index
    %3 = vector.load %arg3[%c0_3, %c0_4] : memref<1x512xf32, #tpu.memory_space<vmem>>, vector<1x512xf32>
    %4 = vector.broadcast %3 : vector<1x512xf32> to vector<16x512xf32>
    %5 = arith.addf %2, %4 : vector<16x512xf32>
    %cst_5 = arith.constant 0.000000e+00 : f32
    %6 = vector.broadcast %cst_5 : f32 to vector<16x512xf32>
    %7 = arith.maximumf %5, %6 : vector<16x512xf32>
    %8 = arith.truncf %7 : vector<16x512xf32> to vector<16x512xbf16>
    %c0_6 = arith.constant 0 : index
    %c0_7 = arith.constant 0 : index
    %9 = vector.load %arg4[%c0_6, %c0_7] : memref<512x128xbf16, #tpu.memory_space<vmem>>, vector<512x128xbf16>
    %cst_8 = arith.constant dense<0.000000e+00> : vector<16x128xf32>
    %10 = tpu.matmul %8, %9, %cst_8 {dimension_numbers = #tpu.dot_dimension_numbers<[1], [0], [0], [1], [0, 0, 1, 1], [], []>} : vector<16x512xbf16>, vector<512x128xbf16>, vector<16x128xf32> -> vector<16x128xf32>
    %c0_9 = arith.constant 0 : index
    %c0_10 = arith.constant 0 : index
    %11 = vector.load %arg5[%c0_9, %c0_10] : memref<1x128xf32, #tpu.memory_space<vmem>>, vector<1x128xf32>
    %12 = vector.broadcast %11 : vector<1x128xf32> to vector<16x128xf32>
    %13 = arith.addf %10, %12 : vector<16x128xf32>
    %14 = arith.negf %13 : vector<16x128xf32>
    %15 = math.exp %14 : vector<16x128xf32>
    %cst_11 = arith.constant 1.000000e+00 : f32
    %16 = vector.broadcast %cst_11 : f32 to vector<16x128xf32>
    %17 = arith.addf %16, %15 : vector<16x128xf32>
    %18 = arith.divf %16, %17 : vector<16x128xf32>
    %c0_12 = arith.constant 0 : index
    %c0_13 = arith.constant 0 : index
    %19 = vector.load %arg6[%c0_12, %c0_13] : memref<16x128xf32, #tpu.memory_space<vmem>>, vector<16x128xf32>
    tpu.vector_store %arg6[%c0_12, %c0_13], %18 {strides = array<i32>} : memref<16x128xf32, #tpu.memory_space<vmem>>, vector<16x128xf32>,
    return
  }
  func.func @transform_0(%arg0: i32) -> (i32, i32) {
    %c0_i32 = arith.constant 0 : i32
    %c0_i32_0 = arith.constant 0 : i32
    return %arg0, %c0_i32 : i32, i32
  }
  func.func @transform_1(%arg0: i32) -> (i32, i32) {
    %c0_i32 = arith.constant 0 : i32
    %c0_i32_0 = arith.constant 0 : i32
    %c0_i32_1 = arith.constant 0 : i32
    return %c0_i32, %c0_i32_0 : i32, i32
  }
  func.func @transform_2(%arg0: i32) -> (i32, i32) {
    %c0_i32 = arith.constant 0 : i32
    %c0_i32_0 = arith.constant 0 : i32
    %c0_i32_1 = arith.constant 0 : i32
    return %c0_i32, %c0_i32_0 : i32, i32
  }
  func.func @transform_3(%arg0: i32) -> (i32, i32) {
    %c0_i32 = arith.constant 0 : i32
    %c0_i32_0 = arith.constant 0 : i32
    %c0_i32_1 = arith.constant 0 : i32
    return %c0_i32, %c0_i32_0 : i32, i32
  }
  func.func @transform_4(%arg0: i32) -> (i32, i32) {
    %c0_i32 = arith.constant 0 : i32
    %c0_i32_0 = arith.constant 0 : i32
    %c0_i32_1 = arith.constant 0 : i32
    return %c0_i32, %c0_i32_0 : i32, i32
  }
  func.func @transform_5(%arg0: i32) -> (i32, i32) {
    %c0_i32 = arith.constant 0 : i32
    %c0_i32_0 = arith.constant 0 : i32
    return %arg0, %c0_i32 : i32, i32
  }
}

</mosaic_0001>

<bundles_post_ra>
// kernel: instance_da_forward.1
= control target key start
LH: loop header
LB: loop body
LE: loop exit
PB: predicated region body
PF: predicated region fallthrough
CT: control target
= control target key end

     0   :  { %s5749_s1 = inlined_call_operand.vmem [shape: bf16[1024,512], index: 1, kind: input, shape index: {}]   ;;  %s5750_s0 = inlined_call_operand.vmem [shape: bf16[16,1024], index: 0, kind: input, shape index: {}]   ;;  %s5751_s2 = inlined_call_operand.vmem [shape: f32[1,512], index: 2, kind: input, shape index: {}]   ;;  %s5752_s3 = inlined_call_operand.vmem [shape: bf16[512,128], index: 3, kind: input, shape index: {}]   ;;  %s5753_s4 = inlined_call_operand.vmem [shape: f32[1,128], index: 4, kind: input, shape index: {}]   ;;  %s5754_s5 = inlined_call_operand.vmem [shape: f32[16,128], index: 5, kind: output, shape index: {}]  }
   0x1   :  { %v2580_v0 = vld [vmem:[%s5749_s1 + $0xe0] sm:$0xf]  ;;  %v3658_v1 = vld [vmem:[%s5749_s1 + $0xec] sm:$0xf0] }
   0x2   :  { %v2708_v2 = vld [vmem:[%s5749_s1 + $0x1e0] sm:$0xf]  ;;  %v2581_v3 = vor.u32 %v3658_v1, %v2580_v0  ;;  %v3690_v4 = vld [vmem:[%s5749_s1 + $0x1ec] sm:$0xf0] }
   0x3   :  { %v2836_v5 = vld [vmem:[%s5749_s1 + $0x2e0] sm:$0xf]  ;;  %v3722_v6 = vld [vmem:[%s5749_s1 + $0x2ec] sm:$0xf0]  ;;  %v2709_v7 = vor.u32 %v3690_v4, %v2708_v2 }
   0x4   :  { %v2837_v8 = vor.u32 %v3722_v6, %v2836_v5  ;;  %v2964_v9 = vld [vmem:[%s5749_s1 + $0x3e0] sm:$0xf]  ;;  %v3754_v10 = vld [vmem:[%s5749_s1 + $0x3ec] sm:$0xf0]  ;;  %1614 = vmatpush.bf16.msra.mxu0 %v2581_v3 }
   0x5   :  { %v2564_v11 = vld [vmem:[%s5749_s1 + $0xc0] sm:$0xf]  ;;  %v2965_v12 = vor.u32 %v3754_v10, %v2964_v9  ;;  %v3654_v13 = vld [vmem:[%s5749_s1 + $0xcc] sm:$0xf0]  ;;  %1628 = vmatpush.bf16.msra.mxu1 %v2709_v7 }
   0x6   :  { %v2692_v14 = vld [vmem:[%s5749_s1 + $0x1c0] sm:$0xf]  ;;  %v3686_v15 = vld [vmem:[%s5749_s1 + $0x1cc] sm:$0xf0]  ;;  %1642 = vmatpush.bf16.msra.mxu2 %v2837_v8  ;;  %v2565_v16 = vor.u32 %v3654_v13, %v2564_v11 }
   0x7   :  { %v2693_v17 = vor.u32 %v3686_v15, %v2692_v14  ;;  %v2820_v18 = vld [vmem:[%s5749_s1 + $0x2c0] sm:$0xf]  ;;  %v3718_v19 = vld [vmem:[%s5749_s1 + $0x2cc] sm:$0xf0]  ;;  %1656 = vmatpush.bf16.msra.mxu3 %v2965_v12 }
   0x8   :  { %v2948_v20 = vld [vmem:[%s5749_s1 + $0x3c0] sm:$0xf]  ;;  %v2821_v21 = vor.u32 %v3718_v19, %v2820_v18  ;;  %v3750_v22 = vld [vmem:[%s5749_s1 + $0x3cc] sm:$0xf0]  ;;  %1615 = vmatpush.bf16.msra.mxu0 %v2565_v16 }
   0x9   :  { %v2548_v23 = vld [vmem:[%s5749_s1 + $0xa0] sm:$0xf]  ;;  %v3650_v24 = vld [vmem:[%s5749_s1 + $0xac] sm:$0xf0]  ;;  %v2949_v25 = vor.u32 %v3750_v22, %v2948_v20  ;;  %1629 = vmatpush.bf16.msra.mxu1 %v2693_v17 }
   0xa   :  { %v2676_v26 = vld [vmem:[%s5749_s1 + $0x1a0] sm:$0xf]  ;;  %v3682_v27 = vld [vmem:[%s5749_s1 + $0x1ac] sm:$0xf0]  ;;  %v2549_v29 = vor.u32 %v3650_v24, %v2548_v23  ;;  %1643 = vmatpush.bf16.msra.mxu2 %v2821_v21 }
   0xb   :  { %v2804_v28 = vld [vmem:[%s5749_s1 + $0x2a0] sm:$0xf]  ;;  %v3714_v30 = vld [vmem:[%s5749_s1 + $0x2ac] sm:$0xf0]  ;;  %v2677_v33 = vor.u32 %v3682_v27, %v2676_v26  ;;  %1657 = vmatpush.bf16.msra.mxu3 %v2949_v25 }
   0xc   :  { %v2932_v31 = vld [vmem:[%s5749_s1 + $0x3a0] sm:$0xf]  ;;  %v3746_v32 = vld [vmem:[%s5749_s1 + $0x3ac] sm:$0xf0]  ;;  %v2805_v34 = vor.u32 %v3714_v30, %v2804_v28  ;;  %1616 = vmatpush.bf16.msra.mxu0 %v2549_v29 }
   0xd   :  { %v2532_v35 = vld [vmem:[%s5749_s1 + $0x80] sm:$0xf]  ;;  %v3646_v36 = vld [vmem:[%s5749_s1 + $0x8c] sm:$0xf0]  ;;  %v2933_v38 = vor.u32 %v3746_v32, %v2932_v31  ;;  %1630 = vmatpush.bf16.msra.mxu1 %v2677_v33 }
   0xe   :  { %v2660_v37 = vld [vmem:[%s5749_s1 + $0x180] sm:$0xf]  ;;  %v3678_v39 = vld [vmem:[%s5749_s1 + $0x18c] sm:$0xf0]  ;;  %v2533_v44 = vor.u32 %v3646_v36, %v2532_v35  ;;  %1644 = vmatpush.bf16.msra.mxu2 %v2805_v34 }
   0xf   :  { %v2788_v40 = vld [vmem:[%s5749_s1 + $0x280] sm:$0xf]  ;;  %v3710_v41 = vld [vmem:[%s5749_s1 + $0x28c] sm:$0xf0]  ;;  %v2661_v45 = vor.u32 %v3678_v39, %v2660_v37  ;;  %1658 = vmatpush.bf16.msra.mxu3 %v2933_v38 }
  0x10   :  { %v2916_v42 = vld [vmem:[%s5749_s1 + $0x380] sm:$0xf]  ;;  %v3742_v43 = vld [vmem:[%s5749_s1 + $0x38c] sm:$0xf0]  ;;  %v2789_v46 = vor.u32 %v3710_v41, %v2788_v40  ;;  %1617 = vmatpush.bf16.msra.mxu0 %v2533_v44 }
  0x11   :  { %v2516_v47 = vld [vmem:[%s5749_s1 + $0x60] sm:$0xf]  ;;  %v3642_v48 = vld [vmem:[%s5749_s1 + $0x6c] sm:$0xf0]  ;;  %v2917_v50 = vor.u32 %v3742_v43, %v2916_v42  ;;  %1631 = vmatpush.bf16.msra.mxu1 %v2661_v45 }
  0x12   :  { %v2644_v49 = vld [vmem:[%s5749_s1 + $0x160] sm:$0xf]  ;;  %v3674_v51 = vld [vmem:[%s5749_s1 + $0x16c] sm:$0xf0]  ;;  %v2517_v56 = vor.u32 %v3642_v48, %v2516_v47  ;;  %1645 = vmatpush.bf16.msra.mxu2 %v2789_v46 }
  0x13   :  { %v2772_v52 = vld [vmem:[%s5749_s1 + $0x260] sm:$0xf]  ;;  %v3706_v53 = vld [vmem:[%s5749_s1 + $0x26c] sm:$0xf0]  ;;  %v2645_v57 = vor.u32 %v3674_v51, %v2644_v49  ;;  %1659 = vmatpush.bf16.msra.mxu3 %v2917_v50 }
  0x14   :  { %v2900_v54 = vld [vmem:[%s5749_s1 + $0x360] sm:$0xf]  ;;  %v3738_v55 = vld [vmem:[%s5749_s1 + $0x36c] sm:$0xf0]  ;;  %v2773_v58 = vor.u32 %v3706_v53, %v2772_v52  ;;  %1618 = vmatpush.bf16.msra.mxu0 %v2517_v56 }
  0x15   :  { %v2500_v59 = vld [vmem:[%s5749_s1 + $0x40] sm:$0xf]  ;;  %v3638_v60 = vld [vmem:[%s5749_s1 + $0x4c] sm:$0xf0]  ;;  %v2901_v62 = vor.u32 %v3738_v55, %v2900_v54  ;;  %1632 = vmatpush.bf16.msra.mxu1 %v2645_v57  ;;  %v2444_v54 = vld [vmem:[%s5750_s0 + $0x8] sm:$0xf] }
  0x16   :  { %v2628_v61 = vld [vmem:[%s5749_s1 + $0x140] sm:$0xf]  ;;  %v3670_v63 = vld [vmem:[%s5749_s1 + $0x14c] sm:$0xf0]  ;;  %v2501_v4 = vor.u32 %v3638_v60, %v2500_v59  ;;  %1646 = vmatpush.bf16.msra.mxu2 %v2773_v58  ;;  %v3625_v59 = vld [vmem:[%s5750_s0 + $0x24] sm:$0xf0] }
  0x17   :  { %v2756_v0 = vld [vmem:[%s5749_s1 + $0x240] sm:$0xf]  ;;  %v3702_v1 = vld [vmem:[%s5749_s1 + $0x24c] sm:$0xf0]  ;;  %v2629_v5 = vor.u32 %v3670_v63, %v2628_v61  ;;  %1660 = vmatpush.bf16.msra.mxu3 %v2901_v62 }
  0x18   :  { %v2884_v2 = vld [vmem:[%s5749_s1 + $0x340] sm:$0xf]  ;;  %v3734_v3 = vld [vmem:[%s5749_s1 + $0x34c] sm:$0xf0]  ;;  %v2757_v6 = vor.u32 %v3702_v1, %v2756_v0  ;;  %1619 = vmatpush.bf16.msra.mxu0 %v2501_v4  ;;  %v4224_v1 = vor.u32 %v3625_v59, %v2444_v54 }
  0x19   :  { %v2484_v7 = vld [vmem:[%s5749_s1 + $0x20] sm:$0xf]  ;;  %v3634_v8 = vld [vmem:[%s5749_s1 + $0x2c] sm:$0xf0]  ;;  %v2885_v10 = vor.u32 %v3734_v3, %v2884_v2  ;;  %1633 = vmatpush.bf16.msra.mxu1 %v2629_v5 }
  0x1a   :  { %v2612_v9 = vld [vmem:[%s5749_s1 + $0x120] sm:$0xf]  ;;  %v3666_v11 = vld [vmem:[%s5749_s1 + $0x12c] sm:$0xf0]  ;;  %v2485_v16 = vor.u32 %v3634_v8, %v2484_v7  ;;  %1647 = vmatpush.bf16.msra.mxu2 %v2757_v6  ;;  %v3620_v6 = vld [vmem:[%s5750_s0 + $0x4] sm:$0xf] }
  0x1b   :  { %v2740_v12 = vld [vmem:[%s5749_s1 + $0x220] sm:$0xf]  ;;  %v3698_v13 = vld [vmem:[%s5749_s1 + $0x22c] sm:$0xf0]  ;;  %v2613_v19 = vor.u32 %v3666_v11, %v2612_v9  ;;  %1661 = vmatpush.bf16.msra.mxu3 %v2885_v10  ;;  %v2438_v7 = vld [vmem:[%s5750_s0 + $0x20] sm:$0xf0] }
  0x1c   :  { %v2868_v14 = vld [vmem:[%s5749_s1 + $0x320] sm:$0xf]  ;;  %v3730_v15 = vld [vmem:[%s5749_s1 + $0x32c] sm:$0xf0]  ;;  %v2741_v20 = vor.u32 %v3698_v13, %v2740_v12  ;;  %1620 = vmatpush.bf16.msra.mxu0 %v2485_v16  ;;  %v3621_v8 = vld [vmem:[%s5750_s0 + $0xc] sm:$0xf]  ;;  %v4246_v10 = vor.u32 %v3620_v6, %v2438_v7 }
  0x1d   :  { %v2468_v17 = vld [vmem:[%s5749_s1] sm:$0xf]  ;;  %v3630_v18 = vld [vmem:[%s5749_s1 + $0xc] sm:$0xf0]  ;;  %v2869_v24 = vor.u32 %v3730_v15, %v2868_v14  ;;  %1634 = vmatpush.bf16.msra.mxu1 %v2613_v19  ;;  %v2446_v11 = vld [vmem:[%s5750_s0 + $0x28] sm:$0xf0] }
  0x1e   :  { %v2596_v21 = vld [vmem:[%s5749_s1 + $0x100] sm:$0xf]  ;;  %v3662_v22 = vld [vmem:[%s5749_s1 + $0x10c] sm:$0xf0]  ;;  %v2469_v31 = vor.u32 %v3630_v18, %v2468_v17  ;;  %1648 = vmatpush.bf16.msra.mxu2 %v2741_v20  ;;  %v4260_v17 = vor.u32 %v3621_v8, %v2446_v11 }
  0x1f   :  { %v2724_v23 = vld [vmem:[%s5749_s1 + $0x200] sm:$0xf]  ;;  %v3694_v25 = vld [vmem:[%s5749_s1 + $0x20c] sm:$0xf0]  ;;  %v2597_v35 = vor.u32 %v3662_v22, %v2596_v21  ;;  %1662 = vmatpush.bf16.msra.mxu3 %v2869_v24 }
  0x20   :  { %v2852_v26 = vld [vmem:[%s5749_s1 + $0x300] sm:$0xf]  ;;  %v3726_v27 = vld [vmem:[%s5749_s1 + $0x30c] sm:$0xf0]  ;;  %v2725_v36 = vor.u32 %v3694_v25, %v2724_v23  ;;  %1621 = vmatpush.bf16.msra.mxu0 %v2469_v31 }
  0x21   :  { %v3092_v28 = vld [vmem:[%s5749_s1 + $0x4e0] sm:$0xf]  ;;  %v3786_v29 = vld [vmem:[%s5749_s1 + $0x4ec] sm:$0xf0]  ;;  %v2853_v39 = vor.u32 %v3726_v27, %v2852_v26  ;;  %1635 = vmatpush.bf16.msra.mxu1 %v2597_v35 }
  0x22   :  { %v3220_v30 = vld [vmem:[%s5749_s1 + $0x5e0] sm:$0xf]  ;;  %v3818_v32 = vld [vmem:[%s5749_s1 + $0x5ec] sm:$0xf0]  ;;  %v3093_v40 = vor.u32 %v3786_v29, %v3092_v28  ;;  %1649 = vmatpush.bf16.msra.mxu2 %v2725_v36 }
  0x23   :  { %v3348_v33 = vld [vmem:[%s5749_s1 + $0x6e0] sm:$0xf]  ;;  %v3850_v34 = vld [vmem:[%s5749_s1 + $0x6ec] sm:$0xf0]  ;;  %v3221_v43 = vor.u32 %v3818_v32, %v3220_v30  ;;  %1663 = vmatpush.bf16.msra.mxu3 %v2853_v39 }
  0x24   :  { %v3476_v37 = vld [vmem:[%s5749_s1 + $0x7e0] sm:$0xf]  ;;  %v3882_v38 = vld [vmem:[%s5749_s1 + $0x7ec] sm:$0xf0]  ;;  %v3349_v44 = vor.u32 %v3850_v34, %v3348_v33  ;;  %1670 = vmatpush.bf16.msrb.mxu0 %v3093_v40  ;;  %1636 = vmatmul.bf16.vlgmr.msra.gmra.mxu1 %v4246_v10 }
  0x25   :  { %v3076_v41 = vld [vmem:[%s5749_s1 + $0x4c0] sm:$0xf]  ;;  %v3782_v42 = vld [vmem:[%s5749_s1 + $0x4cc] sm:$0xf0]  ;;  %v3477_v48 = vor.u32 %v3882_v38, %v3476_v37  ;;  %1684 = vmatpush.bf16.msrb.mxu1 %v3221_v43  ;;  %1650 = vmatmul.bf16.vlgmr.msra.gmra.mxu2 %v4224_v1 }
  0x26   :  { %v3204_v45 = vld [vmem:[%s5749_s1 + $0x5c0] sm:$0xf]  ;;  %v3814_v46 = vld [vmem:[%s5749_s1 + $0x5cc] sm:$0xf0]  ;;  %v3077_v55 = vor.u32 %v3782_v42, %v3076_v41  ;;  %1698 = vmatpush.bf16.msrb.mxu2 %v3349_v44  ;;  %1664 = vmatmul.bf16.vlgmr.msra.gmra.mxu3 %v4260_v17 }
  0x27   :  { %v3332_v47 = vld [vmem:[%s5749_s1 + $0x6c0] sm:$0xf]  ;;  %v3846_v49 = vld [vmem:[%s5749_s1 + $0x6cc] sm:$0xf0]  ;;  %v3205_v60 = vor.u32 %v3814_v46, %v3204_v45  ;;  %1712 = vmatpush.bf16.msrb.mxu3 %v3477_v48 }
  0x28   :  { %v3460_v50 = vld [vmem:[%s5749_s1 + $0x7c0] sm:$0xf]  ;;  %v3878_v51 = vld [vmem:[%s5749_s1 + $0x7cc] sm:$0xf0]  ;;  %v3333_v61 = vor.u32 %v3846_v49, %v3332_v47  ;;  %1671 = vmatpush.bf16.msrb.mxu0 %v3077_v55 }
  0x29   :  { %v2436_v52 = vld [vmem:[%s5750_s0] sm:$0xf]  ;;  %v3778_v57 = vld [vmem:[%s5749_s1 + $0x4ac] sm:$0xf0]  ;;  %v3461_v2 = vor.u32 %v3878_v51, %v3460_v50  ;;  %1685 = vmatpush.bf16.msrb.mxu1 %v3205_v60 }
  0x2a   :  { %v3624_v53 = vld [vmem:[%s5750_s0 + $0x1c] sm:$0xf0]  ;;  %v3810_v63 = vld [vmem:[%s5749_s1 + $0x5ac] sm:$0xf0]  ;;  %1699 = vmatpush.bf16.msrb.mxu2 %v3333_v61 }
  0x2b   :  { %v3060_v56 = vld [vmem:[%s5749_s1 + $0x4a0] sm:$0xf]  ;;  %v4210_v58 = vor.u32 %v3624_v53, %v2436_v52  ;;  %v3842_v3 = vld [vmem:[%s5749_s1 + $0x6ac] sm:$0xf0]  ;;  %1713 = vmatpush.bf16.msrb.mxu3 %v3461_v2 }
  0x2c   :  { %v3188_v62 = vld [vmem:[%s5749_s1 + $0x5a0] sm:$0xf]  ;;  %v3874_v5 = vld [vmem:[%s5749_s1 + $0x7ac] sm:$0xf0]  ;;  %v3061_v9 = vor.u32 %v3778_v57, %v3060_v56 }
  0x2d   :  { %v3316_v0 = vld [vmem:[%s5749_s1 + $0x6a0] sm:$0xf]  ;;  %1622 = vmatmul.bf16.vlgmr.msra.gmra.mxu0 %v4210_v58  ;;  %v3189_v12 = vor.u32 %v3810_v63, %v3188_v62  ;;  %v3774_v15 = vld [vmem:[%s5749_s1 + $0x48c] sm:$0xf0] }
  0x2e   :  { %v3444_v4 = vld [vmem:[%s5749_s1 + $0x7a0] sm:$0xf]  ;;  %v3317_v13 = vor.u32 %v3842_v3, %v3316_v0  ;;  %v3806_v19 = vld [vmem:[%s5749_s1 + $0x58c] sm:$0xf0]  ;;  %1672 = vmatpush.bf16.msrb.mxu0 %v3061_v9  ;;  %v3656_v9 = vld [vmem:[%s5749_s1 + $0xe4] sm:$0xf] }
  0x2f   :  { %v3044_v14 = vld [vmem:[%s5749_s1 + $0x480] sm:$0xf]  ;;  %v3445_v18 = vor.u32 %v3874_v5, %v3444_v4  ;;  %v3838_v21 = vld [vmem:[%s5749_s1 + $0x68c] sm:$0xf0]  ;;  %1686 = vmatpush.bf16.msrb.mxu1 %v3189_v12  ;;  %v2582_v12 = vld [vmem:[%s5749_s1 + $0xf0] sm:$0xf0] }
  0x30   :  { %v3172_v16 = vld [vmem:[%s5749_s1 + $0x580] sm:$0xf]  ;;  %v3870_v23 = vld [vmem:[%s5749_s1 + $0x78c] sm:$0xf0]  ;;  %v3045_v24 = vor.u32 %v3774_v15, %v3044_v14  ;;  %1700 = vmatpush.bf16.msrb.mxu2 %v3317_v13  ;;  %v3688_v13 = vld [vmem:[%s5749_s1 + $0x1e4] sm:$0xf] }
  0x31   :  { %v3300_v20 = vld [vmem:[%s5749_s1 + $0x680] sm:$0xf]  ;;  %v3173_v25 = vor.u32 %v3806_v19, %v3172_v16  ;;  %v3770_v28 = vld [vmem:[%s5749_s1 + $0x46c] sm:$0xf0]  ;;  %1714 = vmatpush.bf16.msrb.mxu3 %v3445_v18  ;;  %v2710_v14 = vld [vmem:[%s5749_s1 + $0x1f0] sm:$0xf0] }
  0x32   :  { %v3428_v22 = vld [vmem:[%s5749_s1 + $0x780] sm:$0xf]  ;;  %v3301_v26 = vor.u32 %v3838_v21, %v3300_v20  ;;  %v3802_v31 = vld [vmem:[%s5749_s1 + $0x56c] sm:$0xf0]  ;;  %1673 = vmatpush.bf16.msrb.mxu0 %v3045_v24  ;;  %v3720_v15 = vld [vmem:[%s5749_s1 + $0x2e4] sm:$0xf] }
  0x33   :  { %v3028_v27 = vld [vmem:[%s5749_s1 + $0x460] sm:$0xf]  ;;  %v3429_v30 = vor.u32 %v3870_v23, %v3428_v22  ;;  %v3834_v33 = vld [vmem:[%s5749_s1 + $0x66c] sm:$0xf0]  ;;  %1687 = vmatpush.bf16.msrb.mxu1 %v3173_v25  ;;  %v2838_v16 = vld [vmem:[%s5749_s1 + $0x2f0] sm:$0xf0] }
  0x34   :  { %v3156_v29 = vld [vmem:[%s5749_s1 + $0x560] sm:$0xf]  ;;  %v3866_v35 = vld [vmem:[%s5749_s1 + $0x76c] sm:$0xf0]  ;;  %v3029_v36 = vor.u32 %v3770_v28, %v3028_v27  ;;  %1701 = vmatpush.bf16.msrb.mxu2 %v3301_v26  ;;  %v3752_v18 = vld [vmem:[%s5749_s1 + $0x3e4] sm:$0xf] }
  0x35   :  { %v3284_v32 = vld [vmem:[%s5749_s1 + $0x660] sm:$0xf]  ;;  %v3157_v37 = vor.u32 %v3802_v31, %v3156_v29  ;;  %v3766_v40 = vld [vmem:[%s5749_s1 + $0x44c] sm:$0xf0]  ;;  %1715 = vmatpush.bf16.msrb.mxu3 %v3429_v30  ;;  %v2966_v20 = vld [vmem:[%s5749_s1 + $0x3f0] sm:$0xf0]  ;;  %v2585_v29 = vor.u32 %v3656_v9, %v2582_v12 }
  0x36   :  { %v3412_v34 = vld [vmem:[%s5749_s1 + $0x760] sm:$0xf]  ;;  %v3285_v38 = vor.u32 %v3834_v33, %v3284_v32  ;;  %v3798_v43 = vld [vmem:[%s5749_s1 + $0x54c] sm:$0xf0]  ;;  %1674 = vmatpush.bf16.msrb.mxu0 %v3029_v36  ;;  %v2460_v25 = vld [vmem:[%s5750_s0 + $0x18] sm:$0xf]  ;;  %v2713_v33 = vor.u32 %v3688_v13, %v2710_v14 }
  0x37   :  { %v3012_v39 = vld [vmem:[%s5749_s1 + $0x440] sm:$0xf]  ;;  %v3413_v42 = vor.u32 %v3866_v35, %v3412_v34  ;;  %v3830_v45 = vld [vmem:[%s5749_s1 + $0x64c] sm:$0xf0]  ;;  %1688 = vmatpush.bf16.msrb.mxu1 %v3157_v37  ;;  %v3627_v26 = vld [vmem:[%s5750_s0 + $0x34] sm:$0xf0]  ;;  %v2841_v34 = vor.u32 %v3720_v15, %v2838_v16 }
  0x38   :  { %v3140_v41 = vld [vmem:[%s5749_s1 + $0x540] sm:$0xf]  ;;  %v3862_v47 = vld [vmem:[%s5749_s1 + $0x74c] sm:$0xf0]  ;;  %v3013_v48 = vor.u32 %v3766_v40, %v3012_v39  ;;  %1702 = vmatpush.bf16.msrb.mxu2 %v3285_v38  ;;  %v3622_v27 = vld [vmem:[%s5750_s0 + $0x14] sm:$0xf]  ;;  %v2969_v38 = vor.u32 %v3752_v18, %v2966_v20 }
  0x39   :  { %v3268_v44 = vld [vmem:[%s5749_s1 + $0x640] sm:$0xf]  ;;  %v3141_v50 = vor.u32 %v3798_v43, %v3140_v41  ;;  %v3762_v52 = vld [vmem:[%s5749_s1 + $0x42c] sm:$0xf0]  ;;  %1716 = vmatpush.bf16.msrb.mxu3 %v3413_v42  ;;  %v2454_v30 = vld [vmem:[%s5750_s0 + $0x30] sm:$0xf0]  ;;  %v4443_v43 = vor.u32 %v3627_v26, %v2460_v25 }
  0x3a   :  { %v3396_v46 = vld [vmem:[%s5749_s1 + $0x740] sm:$0xf]  ;;  %v3269_v51 = vor.u32 %v3830_v45, %v3268_v44  ;;  %v3794_v54 = vld [vmem:[%s5749_s1 + $0x52c] sm:$0xf0]  ;;  %1675 = vmatpush.bf16.msrb.mxu0 %v3013_v48  ;;  %v3623_v31 = vld [vmem:[%s5750_s0 + $0x1c] sm:$0xf]  ;;  %v4445_v44 = vor.u32 %v3622_v27, %v2454_v30 }
  0x3b   :  { %v2996_v49 = vld [vmem:[%s5749_s1 + $0x420] sm:$0xf]  ;;  %v3397_v55 = vor.u32 %v3862_v47, %v3396_v46  ;;  %v3826_v57 = vld [vmem:[%s5749_s1 + $0x62c] sm:$0xf0]  ;;  %1689 = vmatpush.bf16.msrb.mxu1 %v3141_v50  ;;  %v2462_v32 = vld [vmem:[%s5750_s0 + $0x38] sm:$0xf0] }
  0x3c   :  { %v3124_v53 = vld [vmem:[%s5749_s1 + $0x520] sm:$0xf]  ;;  %v3858_v60 = vld [vmem:[%s5749_s1 + $0x72c] sm:$0xf0]  ;;  %v2997_v63 = vor.u32 %v3762_v52, %v2996_v49  ;;  %1703 = vmatpush.bf16.msrb.mxu2 %v3269_v51  ;;  %v3652_v35 = vld [vmem:[%s5749_s1 + $0xc4] sm:$0xf]  ;;  %v4453_v47 = vor.u32 %v3623_v31, %v2462_v32 }
  0x3d   :  { %v3252_v56 = vld [vmem:[%s5749_s1 + $0x620] sm:$0xf]  ;;  %v3758_v62 = vld [vmem:[%s5749_s1 + $0x40c] sm:$0xf0]  ;;  %v3125_v5 = vor.u32 %v3794_v54, %v3124_v53  ;;  %1717 = vmatpush.bf16.msrb.mxu3 %v3397_v55  ;;  %v2566_v36 = vld [vmem:[%s5749_s1 + $0xd0] sm:$0xf0] }
  0x3e   :  { %v3380_v59 = vld [vmem:[%s5749_s1 + $0x720] sm:$0xf]  ;;  %v3790_v2 = vld [vmem:[%s5749_s1 + $0x50c] sm:$0xf0]  ;;  %v3253_v6 = vor.u32 %v3826_v57, %v3252_v56  ;;  %1676 = vmatpush.bf16.msrb.mxu0 %v2997_v63  ;;  %v3684_v37 = vld [vmem:[%s5749_s1 + $0x1c4] sm:$0xf]  ;;  %v2569_v48 = vor.u32 %v3652_v35, %v2566_v36 }
  0x3f   :  { %v2980_v61 = vld [vmem:[%s5749_s1 + $0x400] sm:$0xf]  ;;  %v3822_v4 = vld [vmem:[%s5749_s1 + $0x60c] sm:$0xf0]  ;;  %v3381_v11 = vor.u32 %v3858_v60, %v3380_v59  ;;  %1690 = vmatpush.bf16.msrb.mxu1 %v3125_v5  ;;  %v2694_v40 = vld [vmem:[%s5749_s1 + $0x1d0] sm:$0xf0] }
  0x40   :  { %v3108_v0 = vld [vmem:[%s5749_s1 + $0x500] sm:$0xf]  ;;  %v3854_v8 = vld [vmem:[%s5749_s1 + $0x70c] sm:$0xf0]  ;;  %v2981_v19 = vor.u32 %v3758_v62, %v2980_v61  ;;  %1704 = vmatpush.bf16.msrb.mxu2 %v3253_v6  ;;  %v3716_v41 = vld [vmem:[%s5749_s1 + $0x2c4] sm:$0xf]  ;;  %v2697_v49 = vor.u32 %v3684_v37, %v2694_v40 }
  0x41   :  { %v3236_v3 = vld [vmem:[%s5749_s1 + $0x600] sm:$0xf]  ;;  %v2452_v21 = vld [vmem:[%s5750_s0 + $0x10] sm:$0xf]  ;;  %v3109_v23 = vor.u32 %v3790_v2, %v3108_v0  ;;  %1718 = vmatpush.bf16.msrb.mxu3 %v3381_v11  ;;  %v2822_v42 = vld [vmem:[%s5749_s1 + $0x2d0] sm:$0xf0] }
  0x42   :  { %v3364_v7 = vld [vmem:[%s5749_s1 + $0x700] sm:$0xf]  ;;  %v3626_v22 = vld [vmem:[%s5750_s0 + $0x2c] sm:$0xf0]  ;;  %v3237_v24 = vor.u32 %v3822_v4, %v3236_v3  ;;  %1677 = vmatpush.bf16.msrb.mxu0 %v2981_v19  ;;  %v3748_v45 = vld [vmem:[%s5749_s1 + $0x3c4] sm:$0xf]  ;;  %v2825_v50 = vor.u32 %v3716_v41, %v2822_v42 }
  0x43   :  { %v3365_v28 = vor.u32 %v3854_v8, %v3364_v7  ;;  %v4432_v39 = vor.u32 %v3626_v22, %v2452_v21  ;;  %1691 = vmatpush.bf16.msrb.mxu1 %v3109_v23  ;;  %v2950_v46 = vld [vmem:[%s5749_s1 + $0x3d0] sm:$0xf0]  ;;  %v3648_v51 = vld [vmem:[%s5749_s1 + $0xa4] sm:$0xf] }
  0x44   :  { %1705 = vmatpush.bf16.msrb.mxu2 %v3237_v24  ;;  %v2550_v52 = vld [vmem:[%s5749_s1 + $0xb0] sm:$0xf0]  ;;  %v3680_v53 = vld [vmem:[%s5749_s1 + $0x1a4] sm:$0xf]  ;;  %v2953_v54 = vor.u32 %v3748_v45, %v2950_v46 }
  0x45   :  { %1719 = vmatpush.bf16.msrb.mxu3 %v3365_v28  ;;  %1678 = vmatmul.bf16.vlgmr.msrb.gmra.mxu0 %v4432_v39  ;;  %v2678_v55 = vld [vmem:[%s5749_s1 + $0x1b0] sm:$0xf0]  ;;  %v3712_v56 = vld [vmem:[%s5749_s1 + $0x2a4] sm:$0xf]  ;;  %v2553_v61 = vor.u32 %v3648_v51, %v2550_v52 }
  0x46   :  { %1726 = vmatpush.bf16.msra.mxu0 %v2585_v29  ;;  %v2806_v57 = vld [vmem:[%s5749_s1 + $0x2b0] sm:$0xf0]  ;;  %1692 = vmatmul.bf16.vlgmr.msrb.gmra.mxu1 %v4445_v44  ;;  %v3744_v59 = vld [vmem:[%s5749_s1 + $0x3a4] sm:$0xf]  ;;  %v2681_v62 = vor.u32 %v3680_v53, %v2678_v55 }
  0x47   :  { %1740 = vmatpush.bf16.msra.mxu1 %v2713_v33  ;;  %1706 = vmatmul.bf16.vlgmr.msrb.gmra.mxu2 %v4443_v43  ;;  %v2934_v60 = vld [vmem:[%s5749_s1 + $0x3b0] sm:$0xf0]  ;;  %v2809_v63 = vor.u32 %v3712_v56, %v2806_v57  ;;  %v3644_v0 = vld [vmem:[%s5749_s1 + $0x84] sm:$0xf] }
  0x48   :  { %1754 = vmatpush.bf16.msra.mxu2 %v2841_v34  ;;  %1720 = vmatmul.bf16.vlgmr.msrb.gmra.mxu3 %v4453_v47  ;;  %v2534_v2 = vld [vmem:[%s5749_s1 + $0x90] sm:$0xf0]  ;;  %v3676_v3 = vld [vmem:[%s5749_s1 + $0x184] sm:$0xf]  ;;  %v2937_v4 = vor.u32 %v3744_v59, %v2934_v60 }
  0x49   :  { %1768 = vmatpush.bf16.msra.mxu3 %v2969_v38  ;;  %v2662_v5 = vld [vmem:[%s5749_s1 + $0x190] sm:$0xf0]  ;;  %v3708_v6 = vld [vmem:[%s5749_s1 + $0x284] sm:$0xf]  ;;  %v2537_v11 = vor.u32 %v3644_v0, %v2534_v2 }
  0x4a   :  { %1727 = vmatpush.bf16.msra.mxu0 %v2569_v48  ;;  %v2790_v7 = vld [vmem:[%s5749_s1 + $0x290] sm:$0xf0]  ;;  %v3740_v8 = vld [vmem:[%s5749_s1 + $0x384] sm:$0xf]  ;;  %v2665_v12 = vor.u32 %v3676_v3, %v2662_v5 }
  0x4b   :  { %1741 = vmatpush.bf16.msra.mxu1 %v2697_v49  ;;  %v2918_v9 = vld [vmem:[%s5749_s1 + $0x390] sm:$0xf0]  ;;  %v2793_v13 = vor.u32 %v3708_v6, %v2790_v7  ;;  %v3640_v14 = vld [vmem:[%s5749_s1 + $0x64] sm:$0xf] }
  0x4c   :  { %1755 = vmatpush.bf16.msra.mxu2 %v2825_v50  ;;  %v2518_v15 = vld [vmem:[%s5749_s1 + $0x70] sm:$0xf0]  ;;  %v3672_v16 = vld [vmem:[%s5749_s1 + $0x164] sm:$0xf]  ;;  %v2921_v18 = vor.u32 %v3740_v8, %v2918_v9 }
  0x4d   :  { %1769 = vmatpush.bf16.msra.mxu3 %v2953_v54  ;;  %v2646_v19 = vld [vmem:[%s5749_s1 + $0x170] sm:$0xf0]  ;;  %v3704_v20 = vld [vmem:[%s5749_s1 + $0x264] sm:$0xf]  ;;  %v2521_v24 = vor.u32 %v3640_v14, %v2518_v15 }
  0x4e   :  { %1728 = vmatpush.bf16.msra.mxu0 %v2553_v61  ;;  %v2774_v21 = vld [vmem:[%s5749_s1 + $0x270] sm:$0xf0]  ;;  %v3736_v22 = vld [vmem:[%s5749_s1 + $0x364] sm:$0xf]  ;;  %v2649_v25 = vor.u32 %v3672_v16, %v2646_v19 }
  0x4f   :  { %1742 = vmatpush.bf16.msra.mxu1 %v2681_v62  ;;  %v2902_v23 = vld [vmem:[%s5749_s1 + $0x370] sm:$0xf0]  ;;  %v2777_v26 = vor.u32 %v3704_v20, %v2774_v21  ;;  %v3636_v27 = vld [vmem:[%s5749_s1 + $0x44] sm:$0xf] }
  0x50   :  { %1756 = vmatpush.bf16.msra.mxu2 %v2809_v63  ;;  %v2502_v28 = vld [vmem:[%s5749_s1 + $0x50] sm:$0xf0]  ;;  %v3668_v29 = vld [vmem:[%s5749_s1 + $0x144] sm:$0xf]  ;;  %v2905_v30 = vor.u32 %v3736_v22, %v2902_v23 }
  0x51   :  { %1770 = vmatpush.bf16.msra.mxu3 %v2937_v4  ;;  %v2630_v31 = vld [vmem:[%s5749_s1 + $0x150] sm:$0xf0]  ;;  %v3700_v32 = vld [vmem:[%s5749_s1 + $0x244] sm:$0xf]  ;;  %v2505_v36 = vor.u32 %v3636_v27, %v2502_v28 }
  0x52   :  { %1729 = vmatpush.bf16.msra.mxu0 %v2537_v11  ;;  %v2758_v33 = vld [vmem:[%s5749_s1 + $0x250] sm:$0xf0]  ;;  %v3732_v34 = vld [vmem:[%s5749_s1 + $0x344] sm:$0xf]  ;;  %v2633_v37 = vor.u32 %v3668_v29, %v2630_v31 }
  0x53   :  { %1743 = vmatpush.bf16.msra.mxu1 %v2665_v12  ;;  %v2886_v35 = vld [vmem:[%s5749_s1 + $0x350] sm:$0xf0]  ;;  %v2761_v38 = vor.u32 %v3700_v32, %v2758_v33  ;;  %v3632_v40 = vld [vmem:[%s5749_s1 + $0x24] sm:$0xf] }
  0x54   :  { %1757 = vmatpush.bf16.msra.mxu2 %v2793_v13  ;;  %v2486_v41 = vld [vmem:[%s5749_s1 + $0x30] sm:$0xf0]  ;;  %v3664_v42 = vld [vmem:[%s5749_s1 + $0x124] sm:$0xf]  ;;  %v2889_v45 = vor.u32 %v3732_v34, %v2886_v35 }
  0x55   :  { %1771 = vmatpush.bf16.msra.mxu3 %v2921_v18  ;;  %v2614_v46 = vld [vmem:[%s5749_s1 + $0x130] sm:$0xf0]  ;;  %v3696_v48 = vld [vmem:[%s5749_s1 + $0x224] sm:$0xf]  ;;  %v2489_v52 = vor.u32 %v3632_v40, %v2486_v41 }
  0x56   :  { %1730 = vmatpush.bf16.msra.mxu0 %v2521_v24  ;;  %v2742_v49 = vld [vmem:[%s5749_s1 + $0x230] sm:$0xf0]  ;;  %v3728_v50 = vld [vmem:[%s5749_s1 + $0x324] sm:$0xf]  ;;  %v2617_v55 = vor.u32 %v3664_v42, %v2614_v46 }
  0x57   :  { %1744 = vmatpush.bf16.msra.mxu1 %v2649_v25  ;;  %v2870_v51 = vld [vmem:[%s5749_s1 + $0x330] sm:$0xf0]  ;;  %v3628_v53 = vld [vmem:[%s5749_s1 + $0x4] sm:$0xf]  ;;  %v2745_v56 = vor.u32 %v3696_v48, %v2742_v49 }
  0x58   :  { %1758 = vmatpush.bf16.msra.mxu2 %v2777_v26  ;;  %v2470_v54 = vld [vmem:[%s5749_s1 + $0x10] sm:$0xf0]  ;;  %v3660_v57 = vld [vmem:[%s5749_s1 + $0x104] sm:$0xf]  ;;  %v2873_v61 = vor.u32 %v3728_v50, %v2870_v51 }
  0x59   :  { %1772 = vmatpush.bf16.msra.mxu3 %v2905_v30  ;;  %v2598_v59 = vld [vmem:[%s5749_s1 + $0x110] sm:$0xf0]  ;;  %v3692_v60 = vld [vmem:[%s5749_s1 + $0x204] sm:$0xf]  ;;  %v2473_v5 = vor.u32 %v3628_v53, %v2470_v54 }
  0x5a   :  { %1731 = vmatpush.bf16.msra.mxu0 %v2505_v36  ;;  %v2726_v62 = vld [vmem:[%s5749_s1 + $0x210] sm:$0xf0]  ;;  %v3724_v63 = vld [vmem:[%s5749_s1 + $0x304] sm:$0xf]  ;;  %v2601_v9 = vor.u32 %v3660_v57, %v2598_v59 }
  0x5b   :  { %1745 = vmatpush.bf16.msra.mxu1 %v2633_v37  ;;  %v2854_v0 = vld [vmem:[%s5749_s1 + $0x310] sm:$0xf0]  ;;  %v3784_v2 = vld [vmem:[%s5749_s1 + $0x4e4] sm:$0xf]  ;;  %v2729_v11 = vor.u32 %v3692_v60, %v2726_v62 }
  0x5c   :  { %1759 = vmatpush.bf16.msra.mxu2 %v2761_v38  ;;  %v3094_v3 = vld [vmem:[%s5749_s1 + $0x4f0] sm:$0xf0]  ;;  %v3816_v4 = vld [vmem:[%s5749_s1 + $0x5e4] sm:$0xf]  ;;  %v2857_v14 = vor.u32 %v3724_v63, %v2854_v0 }
  0x5d   :  { %1773 = vmatpush.bf16.msra.mxu3 %v2889_v45  ;;  %v3222_v6 = vld [vmem:[%s5749_s1 + $0x5f0] sm:$0xf0]  ;;  %v3848_v7 = vld [vmem:[%s5749_s1 + $0x6e4] sm:$0xf]  ;;  %v3097_v15 = vor.u32 %v3784_v2, %v3094_v3 }
  0x5e   :  { %1732 = vmatpush.bf16.msra.mxu0 %v2489_v52  ;;  %v3350_v8 = vld [vmem:[%s5749_s1 + $0x6f0] sm:$0xf0]  ;;  %v3880_v12 = vld [vmem:[%s5749_s1 + $0x7e4] sm:$0xf]  ;;  %v3225_v16 = vor.u32 %v3816_v4, %v3222_v6 }
  0x5f   :  { %1746 = vmatpush.bf16.msra.mxu1 %v2617_v55  ;;  %v3478_v13 = vld [vmem:[%s5749_s1 + $0x7f0] sm:$0xf0]  ;;  %v3353_v18 = vor.u32 %v3848_v7, %v3350_v8  ;;  %v3780_v19 = vld [vmem:[%s5749_s1 + $0x4c4] sm:$0xf] }
  0x60   :  { %1760 = vmatpush.bf16.msra.mxu2 %v2745_v56  ;;  %v3078_v20 = vld [vmem:[%s5749_s1 + $0x4d0] sm:$0xf0]  ;;  %v3812_v21 = vld [vmem:[%s5749_s1 + $0x5c4] sm:$0xf]  ;;  %v3481_v22 = vor.u32 %v3880_v12, %v3478_v13 }
  0x61   :  { %1774 = vmatpush.bf16.msra.mxu3 %v2873_v61  ;;  %v3206_v23 = vld [vmem:[%s5749_s1 + $0x5d0] sm:$0xf0]  ;;  %v3844_v24 = vld [vmem:[%s5749_s1 + $0x6c4] sm:$0xf]  ;;  %v3081_v28 = vor.u32 %v3780_v19, %v3078_v20 }
  0x62   :  { %1733 = vmatpush.bf16.msra.mxu0 %v2473_v5  ;;  %v3334_v25 = vld [vmem:[%s5749_s1 + $0x6d0] sm:$0xf0]  ;;  %v3876_v26 = vld [vmem:[%s5749_s1 + $0x7c4] sm:$0xf]  ;;  %v3209_v29 = vor.u32 %v3812_v21, %v3206_v23 }
  0x63   :  { %1747 = vmatpush.bf16.msra.mxu1 %v2601_v9  ;;  %v3462_v27 = vld [vmem:[%s5749_s1 + $0x7d0] sm:$0xf0]  ;;  %v3337_v30 = vor.u32 %v3844_v24, %v3334_v25  ;;  %v3776_v31 = vld [vmem:[%s5749_s1 + $0x4a4] sm:$0xf] }
  0x64   :  { %1761 = vmatpush.bf16.msra.mxu2 %v2729_v11  ;;  %v3062_v32 = vld [vmem:[%s5749_s1 + $0x4b0] sm:$0xf0]  ;;  %v3808_v33 = vld [vmem:[%s5749_s1 + $0x5a4] sm:$0xf]  ;;  %v3465_v34 = vor.u32 %v3876_v26, %v3462_v27 }
  0x65   :  { %1775 = vmatpush.bf16.msra.mxu3 %v2857_v14  ;;  %v3190_v35 = vld [vmem:[%s5749_s1 + $0x5b0] sm:$0xf0]  ;;  %v3840_v36 = vld [vmem:[%s5749_s1 + $0x6a4] sm:$0xf]  ;;  %1734 = vmatmul.bf16.vlgmr.msra.gmra.mxu0 %v4210_v58  ;;  %v3065_v41 = vor.u32 %v3776_v31, %v3062_v32 }
  0x66   :  { %1782 = vmatpush.bf16.msrb.mxu0 %v3097_v15  ;;  %v3318_v37 = vld [vmem:[%s5749_s1 + $0x6b0] sm:$0xf0]  ;;  %v3872_v38 = vld [vmem:[%s5749_s1 + $0x7a4] sm:$0xf]  ;;  %1748 = vmatmul.bf16.vlgmr.msra.gmra.mxu1 %v4246_v10  ;;  %v3193_v42 = vor.u32 %v3808_v33, %v3190_v35 }
  0x67   :  { %1796 = vmatpush.bf16.msrb.mxu1 %v3225_v16  ;;  %v3446_v40 = vld [vmem:[%s5749_s1 + $0x7b0] sm:$0xf0]  ;;  %1762 = vmatmul.bf16.vlgmr.msra.gmra.mxu2 %v4224_v1  ;;  %v3321_v45 = vor.u32 %v3840_v36, %v3318_v37  ;;  %v3772_v46 = vld [vmem:[%s5749_s1 + $0x484] sm:$0xf] }
  0x68   :  { %1810 = vmatpush.bf16.msrb.mxu2 %v3353_v18  ;;  %1776 = vmatmul.bf16.vlgmr.msra.gmra.mxu3 %v4260_v17  ;;  %v3046_v48 = vld [vmem:[%s5749_s1 + $0x490] sm:$0xf0]  ;;  %v3804_v49 = vld [vmem:[%s5749_s1 + $0x584] sm:$0xf]  ;;  %v3449_v50 = vor.u32 %v3872_v38, %v3446_v40 }
  0x69   :  { %1824 = vmatpush.bf16.msrb.mxu3 %v3481_v22  ;;  %v3174_v51 = vld [vmem:[%s5749_s1 + $0x590] sm:$0xf0]  ;;  %v3836_v52 = vld [vmem:[%s5749_s1 + $0x684] sm:$0xf]  ;;  %v3049_v56 = vor.u32 %v3772_v46, %v3046_v48  ;;  %v2588_v48 = vld [vmem:[%s5749_s1 + $0xe8] sm:$0xf] }
  0x6a   :  { %1783 = vmatpush.bf16.msrb.mxu0 %v3081_v28  ;;  %v3302_v53 = vld [vmem:[%s5749_s1 + $0x690] sm:$0xf0]  ;;  %v3868_v54 = vld [vmem:[%s5749_s1 + $0x784] sm:$0xf]  ;;  %v3177_v57 = vor.u32 %v3804_v49, %v3174_v51  ;;  %v3659_v49 = vld [vmem:[%s5749_s1 + $0xf4] sm:$0xf0] }
  0x6b   :  { %1797 = vmatpush.bf16.msrb.mxu1 %v3209_v29  ;;  %v3430_v55 = vld [vmem:[%s5749_s1 + $0x790] sm:$0xf0]  ;;  %v3305_v59 = vor.u32 %v3836_v52, %v3302_v53  ;;  %v3768_v60 = vld [vmem:[%s5749_s1 + $0x464] sm:$0xf]  ;;  %v3691_v52 = vld [vmem:[%s5749_s1 + $0x1f4] sm:$0xf0] }
  0x6c   :  { %1811 = vmatpush.bf16.msrb.mxu2 %v3337_v30  ;;  %v3030_v61 = vld [vmem:[%s5749_s1 + $0x470] sm:$0xf0]  ;;  %v3800_v62 = vld [vmem:[%s5749_s1 + $0x564] sm:$0xf]  ;;  %v3433_v63 = vor.u32 %v3868_v54, %v3430_v55  ;;  %v2844_v53 = vld [vmem:[%s5749_s1 + $0x2e8] sm:$0xf] }
  0x6d   :  { %1825 = vmatpush.bf16.msrb.mxu3 %v3465_v34  ;;  %v3158_v0 = vld [vmem:[%s5749_s1 + $0x570] sm:$0xf0]  ;;  %v3832_v2 = vld [vmem:[%s5749_s1 + $0x664] sm:$0xf]  ;;  %v3033_v6 = vor.u32 %v3768_v60, %v3030_v61  ;;  %v3723_v54 = vld [vmem:[%s5749_s1 + $0x2f4] sm:$0xf0]  ;;  %v2589_v61 = vor.u32 %v3659_v49, %v2588_v48 }
  0x6e   :  { %1784 = vmatpush.bf16.msrb.mxu0 %v3065_v41  ;;  %v3286_v3 = vld [vmem:[%s5749_s1 + $0x670] sm:$0xf0]  ;;  %v3864_v4 = vld [vmem:[%s5749_s1 + $0x764] sm:$0xf]  ;;  %v3161_v7 = vor.u32 %v3800_v62, %v3158_v0  ;;  %v2572_v0 = vld [vmem:[%s5749_s1 + $0xc8] sm:$0xf] }
  0x6f   :  { %1798 = vmatpush.bf16.msrb.mxu1 %v3193_v42  ;;  %v3414_v5 = vld [vmem:[%s5749_s1 + $0x770] sm:$0xf0]  ;;  %v3289_v8 = vor.u32 %v3832_v2, %v3286_v3  ;;  %v3764_v9 = vld [vmem:[%s5749_s1 + $0x444] sm:$0xf]  ;;  %v3655_v2 = vld [vmem:[%s5749_s1 + $0xd4] sm:$0xf0] }
  0x70   :  { %1812 = vmatpush.bf16.msrb.mxu2 %v3321_v45  ;;  %v3014_v11 = vld [vmem:[%s5749_s1 + $0x450] sm:$0xf0]  ;;  %v3796_v12 = vld [vmem:[%s5749_s1 + $0x544] sm:$0xf]  ;;  %v3417_v13 = vor.u32 %v3864_v4, %v3414_v5  ;;  %v2700_v3 = vld [vmem:[%s5749_s1 + $0x1c8] sm:$0xf] }
  0x71   :  { %1826 = vmatpush.bf16.msrb.mxu3 %v3449_v50  ;;  %v3142_v14 = vld [vmem:[%s5749_s1 + $0x550] sm:$0xf0]  ;;  %v3828_v15 = vld [vmem:[%s5749_s1 + $0x644] sm:$0xf]  ;;  %v3017_v20 = vor.u32 %v3764_v9, %v3014_v11  ;;  %v2716_v50 = vld [vmem:[%s5749_s1 + $0x1e8] sm:$0xf]  ;;  %v2573_v11 = vor.u32 %v3655_v2, %v2572_v0 }
  0x72   :  { %1785 = vmatpush.bf16.msrb.mxu0 %v3049_v56  ;;  %v3270_v16 = vld [vmem:[%s5749_s1 + $0x650] sm:$0xf0]  ;;  %v3860_v18 = vld [vmem:[%s5749_s1 + $0x744] sm:$0xf]  ;;  %v3145_v21 = vor.u32 %v3796_v12, %v3142_v14  ;;  %v2717_v62 = vor.u32 %v3691_v52, %v2716_v50  ;;  %v3687_v5 = vld [vmem:[%s5749_s1 + $0x1d4] sm:$0xf0] }
  0x73   :  { %1799 = vmatpush.bf16.msrb.mxu1 %v3177_v57  ;;  %v3398_v19 = vld [vmem:[%s5749_s1 + $0x750] sm:$0xf0]  ;;  %v3273_v22 = vor.u32 %v3828_v15, %v3270_v16  ;;  %v3760_v23 = vld [vmem:[%s5749_s1 + $0x424] sm:$0xf]  ;;  %v2972_v57 = vld [vmem:[%s5749_s1 + $0x3e8] sm:$0xf]  ;;  %v2701_v12 = vor.u32 %v3687_v5, %v2700_v3 }
  0x74   :  { %1813 = vmatpush.bf16.msrb.mxu2 %v3305_v59  ;;  %v2998_v24 = vld [vmem:[%s5749_s1 + $0x430] sm:$0xf0]  ;;  %v3792_v25 = vld [vmem:[%s5749_s1 + $0x524] sm:$0xf]  ;;  %v3401_v26 = vor.u32 %v3860_v18, %v3398_v19  ;;  %v3755_v59 = vld [vmem:[%s5749_s1 + $0x3f4] sm:$0xf0] }
  0x75   :  { %1827 = vmatpush.bf16.msrb.mxu3 %v3433_v63  ;;  %v3126_v27 = vld [vmem:[%s5749_s1 + $0x530] sm:$0xf0]  ;;  %v3824_v28 = vld [vmem:[%s5749_s1 + $0x624] sm:$0xf]  ;;  %v3001_v32 = vor.u32 %v3760_v23, %v2998_v24  ;;  %v2845_v63 = vor.u32 %v3723_v54, %v2844_v53  ;;  %v2973_v4 = vor.u32 %v3755_v59, %v2972_v57  ;;  %v3751_v9 = vld [vmem:[%s5749_s1 + $0x3d4] sm:$0xf0] }
  0x76   :  { %1786 = vmatpush.bf16.msrb.mxu0 %v3033_v6  ;;  %v3254_v29 = vld [vmem:[%s5749_s1 + $0x630] sm:$0xf0]  ;;  %v3856_v30 = vld [vmem:[%s5749_s1 + $0x724] sm:$0xf]  ;;  %v3129_v35 = vor.u32 %v3792_v25, %v3126_v27  ;;  %v2828_v6 = vld [vmem:[%s5749_s1 + $0x2c8] sm:$0xf] }
  0x77   :  { %1800 = vmatpush.bf16.msrb.mxu1 %v3161_v7  ;;  %v3382_v31 = vld [vmem:[%s5749_s1 + $0x730] sm:$0xf0]  ;;  %v3756_v33 = vld [vmem:[%s5749_s1 + $0x404] sm:$0xf]  ;;  %v3257_v36 = vor.u32 %v3824_v28, %v3254_v29  ;;  %v3719_v7 = vld [vmem:[%s5749_s1 + $0x2d4] sm:$0xf0] }
  0x78   :  { %1814 = vmatpush.bf16.msrb.mxu2 %v3289_v8  ;;  %v2982_v34 = vld [vmem:[%s5749_s1 + $0x410] sm:$0xf0]  ;;  %v3788_v37 = vld [vmem:[%s5749_s1 + $0x504] sm:$0xf]  ;;  %v3385_v41 = vor.u32 %v3856_v30, %v3382_v31  ;;  %v2956_v8 = vld [vmem:[%s5749_s1 + $0x3c8] sm:$0xf] }
  0x79   :  { %1828 = vmatpush.bf16.msrb.mxu3 %v3417_v13  ;;  %v3110_v38 = vld [vmem:[%s5749_s1 + $0x510] sm:$0xf0]  ;;  %v3820_v40 = vld [vmem:[%s5749_s1 + $0x604] sm:$0xf]  ;;  %v2985_v51 = vor.u32 %v3756_v33, %v2982_v34  ;;  %v2829_v13 = vor.u32 %v3719_v7, %v2828_v6  ;;  %v2556_v14 = vld [vmem:[%s5749_s1 + $0xa8] sm:$0xf]  ;;  %v2957_v18 = vor.u32 %v3751_v9, %v2956_v8 }
  0x7a   :  { %1787 = vmatpush.bf16.msrb.mxu0 %v3017_v20  ;;  %v3238_v42 = vld [vmem:[%s5749_s1 + $0x610] sm:$0xf0]  ;;  %v3852_v45 = vld [vmem:[%s5749_s1 + $0x704] sm:$0xf]  ;;  %v3113_v55 = vor.u32 %v3788_v37, %v3110_v38  ;;  %v3651_v15 = vld [vmem:[%s5749_s1 + $0xb4] sm:$0xf0] }
  0x7b   :  { %1801 = vmatpush.bf16.msrb.mxu1 %v3145_v21  ;;  %v3366_v46 = vld [vmem:[%s5749_s1 + $0x710] sm:$0xf0]  ;;  %v3241_v56 = vor.u32 %v3820_v40, %v3238_v42  ;;  %v2684_v16 = vld [vmem:[%s5749_s1 + $0x1a8] sm:$0xf]  ;;  %v3683_v19 = vld [vmem:[%s5749_s1 + $0x1b4] sm:$0xf0]  ;;  %v2557_v24 = vor.u32 %v3651_v15, %v2556_v14 }
  0x7c   :  { %1815 = vmatpush.bf16.msrb.mxu2 %v3273_v22  ;;  %v3369_v60 = vor.u32 %v3852_v45, %v3366_v46  ;;  %v2812_v20 = vld [vmem:[%s5749_s1 + $0x2a8] sm:$0xf]  ;;  %v3715_v21 = vld [vmem:[%s5749_s1 + $0x2b4] sm:$0xf0]  ;;  %v2685_v25 = vor.u32 %v3683_v19, %v2684_v16 }
  0x7d   :  { %1829 = vmatpush.bf16.msrb.mxu3 %v3401_v26  ;;  %v2940_v22 = vld [vmem:[%s5749_s1 + $0x3a8] sm:$0xf]  ;;  %v3747_v23 = vld [vmem:[%s5749_s1 + $0x3b4] sm:$0xf0]  ;;  %v2813_v26 = vor.u32 %v3715_v21, %v2812_v20 }
  0x7e   :  { %1788 = vmatpush.bf16.msrb.mxu0 %v3001_v32  ;;  %v2540_v27 = vld [vmem:[%s5749_s1 + $0x88] sm:$0xf]  ;;  %v3647_v28 = vld [vmem:[%s5749_s1 + $0x94] sm:$0xf0]  ;;  %v2941_v30 = vor.u32 %v3747_v23, %v2940_v22 }
  0x7f   :  { %1802 = vmatpush.bf16.msrb.mxu1 %v3129_v35  ;;  %v2668_v29 = vld [vmem:[%s5749_s1 + $0x188] sm:$0xf]  ;;  %v3679_v31 = vld [vmem:[%s5749_s1 + $0x194] sm:$0xf0] }
  0x80   :  { %1816 = vmatpush.bf16.msrb.mxu2 %v3257_v36  ;;  %v2796_v32 = vld [vmem:[%s5749_s1 + $0x288] sm:$0xf]  ;;  %v3711_v33 = vld [vmem:[%s5749_s1 + $0x294] sm:$0xf0]  ;;  %v2541_v36 = vor.u32 %v3647_v28, %v2540_v27  ;;  %v2669_v37 = vor.u32 %v3679_v31, %v2668_v29 }
  0x81   :  { %1830 = vmatpush.bf16.msrb.mxu3 %v3385_v41  ;;  %v2924_v34 = vld [vmem:[%s5749_s1 + $0x388] sm:$0xf]  ;;  %v3743_v35 = vld [vmem:[%s5749_s1 + $0x394] sm:$0xf0]  ;;  %v2797_v38 = vor.u32 %v3711_v33, %v2796_v32 }
  0x82   :  { %1789 = vmatpush.bf16.msrb.mxu0 %v2985_v51  ;;  %v2524_v40 = vld [vmem:[%s5749_s1 + $0x68] sm:$0xf]  ;;  %v3643_v41 = vld [vmem:[%s5749_s1 + $0x74] sm:$0xf0]  ;;  %v2925_v45 = vor.u32 %v3743_v35, %v2924_v34 }
  0x83   :  { %1803 = vmatpush.bf16.msrb.mxu1 %v3113_v55  ;;  %v2652_v42 = vld [vmem:[%s5749_s1 + $0x168] sm:$0xf]  ;;  %v3675_v46 = vld [vmem:[%s5749_s1 + $0x174] sm:$0xf0]  ;;  %v2525_v52 = vor.u32 %v3643_v41, %v2524_v40 }
  0x84   :  { %1817 = vmatpush.bf16.msrb.mxu2 %v3241_v56  ;;  %v2780_v48 = vld [vmem:[%s5749_s1 + $0x268] sm:$0xf]  ;;  %v3707_v49 = vld [vmem:[%s5749_s1 + $0x274] sm:$0xf0]  ;;  %v2653_v53 = vor.u32 %v3675_v46, %v2652_v42 }
  0x85   :  { %1831 = vmatpush.bf16.msrb.mxu3 %v3369_v60  ;;  %1790 = vmatmul.bf16.vlgmr.msrb.gmra.mxu0 %v4432_v39  ;;  %v2908_v50 = vld [vmem:[%s5749_s1 + $0x368] sm:$0xf]  ;;  %v3739_v51 = vld [vmem:[%s5749_s1 + $0x374] sm:$0xf0]  ;;  %v2781_v54 = vor.u32 %v3707_v49, %v2780_v48 }
  0x86   :  { %1838 = vmatpush.bf16.msra.mxu0 %v2589_v61  ;;  %1804 = vmatmul.bf16.vlgmr.msrb.gmra.mxu1 %v4445_v44  ;;  %v2508_v55 = vld [vmem:[%s5749_s1 + $0x48] sm:$0xf]  ;;  %v3639_v56 = vld [vmem:[%s5749_s1 + $0x54] sm:$0xf0]  ;;  %v2909_v59 = vor.u32 %v3739_v51, %v2908_v50 }
  0x87   :  { %1852 = vmatpush.bf16.msra.mxu1 %v2717_v62  ;;  %1818 = vmatmul.bf16.vlgmr.msrb.gmra.mxu2 %v4443_v43  ;;  %v2636_v57 = vld [vmem:[%s5749_s1 + $0x148] sm:$0xf]  ;;  %v3671_v60 = vld [vmem:[%s5749_s1 + $0x154] sm:$0xf0]  ;;  %v2509_v2 = vor.u32 %v3639_v56, %v2508_v55 }
  0x88   :  { %1866 = vmatpush.bf16.msra.mxu2 %v2845_v63  ;;  %1832 = vmatmul.bf16.vlgmr.msrb.gmra.mxu3 %v4453_v47  ;;  %v2764_v61 = vld [vmem:[%s5749_s1 + $0x248] sm:$0xf]  ;;  %v3703_v62 = vld [vmem:[%s5749_s1 + $0x254] sm:$0xf0]  ;;  %v2637_v3 = vor.u32 %v3671_v60, %v2636_v57 }
  0x89   :  { %1880 = vmatpush.bf16.msra.mxu3 %v2973_v4  ;;  %v2892_v63 = vld [vmem:[%s5749_s1 + $0x348] sm:$0xf]  ;;  %v3735_v0 = vld [vmem:[%s5749_s1 + $0x354] sm:$0xf0]  ;;  %v2765_v4 = vor.u32 %v3703_v62, %v2764_v61 }
  0x8a   :  { %1839 = vmatpush.bf16.msra.mxu0 %v2573_v11  ;;  %v2492_v5 = vld [vmem:[%s5749_s1 + $0x28] sm:$0xf]  ;;  %v3635_v6 = vld [vmem:[%s5749_s1 + $0x34] sm:$0xf0]  ;;  %v2893_v8 = vor.u32 %v3735_v0, %v2892_v63 }
  0x8b   :  { %1853 = vmatpush.bf16.msra.mxu1 %v2701_v12  ;;  %v2620_v7 = vld [vmem:[%s5749_s1 + $0x128] sm:$0xf]  ;;  %v3667_v9 = vld [vmem:[%s5749_s1 + $0x134] sm:$0xf0]  ;;  %v2493_v15 = vor.u32 %v3635_v6, %v2492_v5 }
  0x8c   :  { %1867 = vmatpush.bf16.msra.mxu2 %v2829_v13  ;;  %v2748_v11 = vld [vmem:[%s5749_s1 + $0x228] sm:$0xf]  ;;  %v3699_v12 = vld [vmem:[%s5749_s1 + $0x234] sm:$0xf0]  ;;  %v2621_v19 = vor.u32 %v3667_v9, %v2620_v7 }
  0x8d   :  { %1881 = vmatpush.bf16.msra.mxu3 %v2957_v18  ;;  %v2876_v13 = vld [vmem:[%s5749_s1 + $0x328] sm:$0xf]  ;;  %v3731_v14 = vld [vmem:[%s5749_s1 + $0x334] sm:$0xf0]  ;;  %v2749_v20 = vor.u32 %v3699_v12, %v2748_v11 }
  0x8e   :  { %1840 = vmatpush.bf16.msra.mxu0 %v2557_v24  ;;  %v2476_v16 = vld [vmem:[%s5749_s1 + $0x8] sm:$0xf]  ;;  %v3631_v18 = vld [vmem:[%s5749_s1 + $0x14] sm:$0xf0]  ;;  %v2877_v24 = vor.u32 %v3731_v14, %v2876_v13 }
  0x8f   :  { %1854 = vmatpush.bf16.msra.mxu1 %v2685_v25  ;;  %v2604_v21 = vld [vmem:[%s5749_s1 + $0x108] sm:$0xf]  ;;  %v3663_v22 = vld [vmem:[%s5749_s1 + $0x114] sm:$0xf0]  ;;  %v2477_v31 = vor.u32 %v3631_v18, %v2476_v16 }
  0x90   :  { %1868 = vmatpush.bf16.msra.mxu2 %v2813_v26  ;;  %v2732_v23 = vld [vmem:[%s5749_s1 + $0x208] sm:$0xf]  ;;  %v3695_v25 = vld [vmem:[%s5749_s1 + $0x214] sm:$0xf0]  ;;  %v2605_v35 = vor.u32 %v3663_v22, %v2604_v21 }
  0x91   :  { %1882 = vmatpush.bf16.msra.mxu3 %v2941_v30  ;;  %v2860_v26 = vld [vmem:[%s5749_s1 + $0x308] sm:$0xf]  ;;  %v3727_v27 = vld [vmem:[%s5749_s1 + $0x314] sm:$0xf0] }
  0x92   :  { %1841 = vmatpush.bf16.msra.mxu0 %v2541_v36  ;;  %v3100_v28 = vld [vmem:[%s5749_s1 + $0x4e8] sm:$0xf]  ;;  %v3787_v29 = vld [vmem:[%s5749_s1 + $0x4f4] sm:$0xf0]  ;;  %v2733_v36 = vor.u32 %v3695_v25, %v2732_v23  ;;  %v2861_v40 = vor.u32 %v3727_v27, %v2860_v26 }
  0x93   :  { %1855 = vmatpush.bf16.msra.mxu1 %v2669_v37  ;;  %v3228_v30 = vld [vmem:[%s5749_s1 + $0x5e8] sm:$0xf]  ;;  %v3819_v32 = vld [vmem:[%s5749_s1 + $0x5f4] sm:$0xf0]  ;;  %v3101_v41 = vor.u32 %v3787_v29, %v3100_v28 }
  0x94   :  { %1869 = vmatpush.bf16.msra.mxu2 %v2797_v38  ;;  %v3356_v33 = vld [vmem:[%s5749_s1 + $0x6e8] sm:$0xf]  ;;  %v3851_v34 = vld [vmem:[%s5749_s1 + $0x6f4] sm:$0xf0]  ;;  %v3229_v42 = vor.u32 %v3819_v32, %v3228_v30 }
  0x95   :  { %1883 = vmatpush.bf16.msra.mxu3 %v2925_v45  ;;  %v3484_v37 = vld [vmem:[%s5749_s1 + $0x7e8] sm:$0xf]  ;;  %v3883_v38 = vld [vmem:[%s5749_s1 + $0x7f4] sm:$0xf0]  ;;  %v3357_v45 = vor.u32 %v3851_v34, %v3356_v33 }
  0x96   :  { %1842 = vmatpush.bf16.msra.mxu0 %v2525_v52  ;;  %v3084_v46 = vld [vmem:[%s5749_s1 + $0x4c8] sm:$0xf]  ;;  %v3783_v48 = vld [vmem:[%s5749_s1 + $0x4d4] sm:$0xf0]  ;;  %v3485_v50 = vor.u32 %v3883_v38, %v3484_v37 }
  0x97   :  { %1856 = vmatpush.bf16.msra.mxu1 %v2653_v53  ;;  %v3212_v49 = vld [vmem:[%s5749_s1 + $0x5c8] sm:$0xf]  ;;  %v3815_v51 = vld [vmem:[%s5749_s1 + $0x5d4] sm:$0xf0]  ;;  %v3085_v56 = vor.u32 %v3783_v48, %v3084_v46 }
  0x98   :  { %1870 = vmatpush.bf16.msra.mxu2 %v2781_v54  ;;  %v3340_v52 = vld [vmem:[%s5749_s1 + $0x6c8] sm:$0xf]  ;;  %v3847_v53 = vld [vmem:[%s5749_s1 + $0x6d4] sm:$0xf0]  ;;  %v3213_v57 = vor.u32 %v3815_v51, %v3212_v49 }
  0x99   :  { %1884 = vmatpush.bf16.msra.mxu3 %v2909_v59  ;;  %v3468_v54 = vld [vmem:[%s5749_s1 + $0x7c8] sm:$0xf]  ;;  %v3879_v55 = vld [vmem:[%s5749_s1 + $0x7d4] sm:$0xf0]  ;;  %v3341_v59 = vor.u32 %v3847_v53, %v3340_v52 }
  0x9a   :  { %1843 = vmatpush.bf16.msra.mxu0 %v2509_v2  ;;  %v3068_v60 = vld [vmem:[%s5749_s1 + $0x4a8] sm:$0xf]  ;;  %v3779_v61 = vld [vmem:[%s5749_s1 + $0x4b4] sm:$0xf0]  ;;  %v3469_v63 = vor.u32 %v3879_v55, %v3468_v54 }
  0x9b   :  { %1857 = vmatpush.bf16.msra.mxu1 %v2637_v3  ;;  %v3196_v62 = vld [vmem:[%s5749_s1 + $0x5a8] sm:$0xf]  ;;  %v3811_v0 = vld [vmem:[%s5749_s1 + $0x5b4] sm:$0xf0]  ;;  %v3069_v6 = vor.u32 %v3779_v61, %v3068_v60 }
  0x9c   :  { %1871 = vmatpush.bf16.msra.mxu2 %v2765_v4  ;;  %v3324_v2 = vld [vmem:[%s5749_s1 + $0x6a8] sm:$0xf]  ;;  %v3843_v3 = vld [vmem:[%s5749_s1 + $0x6b4] sm:$0xf0]  ;;  %v3197_v7 = vor.u32 %v3811_v0, %v3196_v62 }
  0x9d   :  { %1885 = vmatpush.bf16.msra.mxu3 %v2893_v8  ;;  %v3452_v4 = vld [vmem:[%s5749_s1 + $0x7a8] sm:$0xf]  ;;  %v3875_v5 = vld [vmem:[%s5749_s1 + $0x7b4] sm:$0xf0]  ;;  %v3325_v8 = vor.u32 %v3843_v3, %v3324_v2 }
  0x9e   :  { %1844 = vmatpush.bf16.msra.mxu0 %v2493_v15  ;;  %v3052_v9 = vld [vmem:[%s5749_s1 + $0x488] sm:$0xf]  ;;  %v3775_v11 = vld [vmem:[%s5749_s1 + $0x494] sm:$0xf0]  ;;  %v3453_v13 = vor.u32 %v3875_v5, %v3452_v4 }
  0x9f   :  { %1858 = vmatpush.bf16.msra.mxu1 %v2621_v19  ;;  %v3180_v12 = vld [vmem:[%s5749_s1 + $0x588] sm:$0xf]  ;;  %v3807_v14 = vld [vmem:[%s5749_s1 + $0x594] sm:$0xf0] }
  0xa0   :  { %1872 = vmatpush.bf16.msra.mxu2 %v2749_v20  ;;  %v3308_v15 = vld [vmem:[%s5749_s1 + $0x688] sm:$0xf]  ;;  %v3839_v16 = vld [vmem:[%s5749_s1 + $0x694] sm:$0xf0]  ;;  %v3053_v20 = vor.u32 %v3775_v11, %v3052_v9  ;;  %v3181_v21 = vor.u32 %v3807_v14, %v3180_v12  ;;  %v3657_v11 = vld [vmem:[%s5749_s1 + $0xec] sm:$0xf] }
  0xa1   :  { %1886 = vmatpush.bf16.msra.mxu3 %v2877_v24  ;;  %v3436_v18 = vld [vmem:[%s5749_s1 + $0x788] sm:$0xf]  ;;  %v3871_v19 = vld [vmem:[%s5749_s1 + $0x794] sm:$0xf0]  ;;  %v3309_v22 = vor.u32 %v3839_v16, %v3308_v15  ;;  %v2590_v12 = vld [vmem:[%s5749_s1 + $0xf8] sm:$0xf0] }
  0xa2   :  { %1845 = vmatpush.bf16.msra.mxu0 %v2477_v31  ;;  %v3036_v23 = vld [vmem:[%s5749_s1 + $0x468] sm:$0xf]  ;;  %v3771_v24 = vld [vmem:[%s5749_s1 + $0x474] sm:$0xf0]  ;;  %v3437_v26 = vor.u32 %v3871_v19, %v3436_v18  ;;  %v2718_v15 = vld [vmem:[%s5749_s1 + $0x1f8] sm:$0xf0] }
  0xa3   :  { %1859 = vmatpush.bf16.msra.mxu1 %v2605_v35  ;;  %v3164_v25 = vld [vmem:[%s5749_s1 + $0x568] sm:$0xf]  ;;  %v3803_v27 = vld [vmem:[%s5749_s1 + $0x574] sm:$0xf0]  ;;  %v3037_v32 = vor.u32 %v3771_v24, %v3036_v23  ;;  %v3721_v16 = vld [vmem:[%s5749_s1 + $0x2ec] sm:$0xf]  ;;  %v2593_v24 = vor.u32 %v3657_v11, %v2590_v12 }
  0xa4   :  { %1873 = vmatpush.bf16.msra.mxu2 %v2733_v36  ;;  %v3292_v28 = vld [vmem:[%s5749_s1 + $0x668] sm:$0xf]  ;;  %v3835_v29 = vld [vmem:[%s5749_s1 + $0x674] sm:$0xf0]  ;;  %v3165_v33 = vor.u32 %v3803_v27, %v3164_v25  ;;  %v2846_v18 = vld [vmem:[%s5749_s1 + $0x2f8] sm:$0xf0] }
  0xa5   :  { %1887 = vmatpush.bf16.msra.mxu3 %v2861_v40  ;;  %1846 = vmatmul.bf16.vlgmr.msra.gmra.mxu0 %v4210_v58  ;;  %v3420_v30 = vld [vmem:[%s5749_s1 + $0x768] sm:$0xf]  ;;  %v3867_v31 = vld [vmem:[%s5749_s1 + $0x774] sm:$0xf0]  ;;  %v3293_v34 = vor.u32 %v3835_v29, %v3292_v28  ;;  %v3653_v27 = vld [vmem:[%s5749_s1 + $0xcc] sm:$0xf] }
  0xa6   :  { %1894 = vmatpush.bf16.msrb.mxu0 %v3101_v41  ;;  %1860 = vmatmul.bf16.vlgmr.msra.gmra.mxu1 %v4246_v10  ;;  %v3020_v35 = vld [vmem:[%s5749_s1 + $0x448] sm:$0xf]  ;;  %v3767_v36 = vld [vmem:[%s5749_s1 + $0x454] sm:$0xf0]  ;;  %v3421_v38 = vor.u32 %v3867_v31, %v3420_v30  ;;  %v2574_v28 = vld [vmem:[%s5749_s1 + $0xd8] sm:$0xf0] }
  0xa7   :  { %1908 = vmatpush.bf16.msrb.mxu1 %v3229_v42  ;;  %1874 = vmatmul.bf16.vlgmr.msra.gmra.mxu2 %v4224_v1  ;;  %v3148_v37 = vld [vmem:[%s5749_s1 + $0x548] sm:$0xf]  ;;  %v3799_v40 = vld [vmem:[%s5749_s1 + $0x554] sm:$0xf0]  ;;  %v3021_v48 = vor.u32 %v3767_v36, %v3020_v35  ;;  %v3685_v29 = vld [vmem:[%s5749_s1 + $0x1cc] sm:$0xf]  ;;  %v2577_v36 = vor.u32 %v3653_v27, %v2574_v28 }
  0xa8   :  { %1922 = vmatpush.bf16.msrb.mxu2 %v3357_v45  ;;  %1888 = vmatmul.bf16.vlgmr.msra.gmra.mxu3 %v4260_v17  ;;  %v3276_v41 = vld [vmem:[%s5749_s1 + $0x648] sm:$0xf]  ;;  %v3831_v42 = vld [vmem:[%s5749_s1 + $0x654] sm:$0xf0]  ;;  %v3149_v49 = vor.u32 %v3799_v40, %v3148_v37  ;;  %v2702_v31 = vld [vmem:[%s5749_s1 + $0x1d8] sm:$0xf0] }
  0xa9   :  { %1936 = vmatpush.bf16.msrb.mxu3 %v3485_v50  ;;  %v3404_v45 = vld [vmem:[%s5749_s1 + $0x748] sm:$0xf]  ;;  %v3863_v46 = vld [vmem:[%s5749_s1 + $0x754] sm:$0xf0]  ;;  %v3277_v50 = vor.u32 %v3831_v42, %v3276_v41  ;;  %v2958_v35 = vld [vmem:[%s5749_s1 + $0x3d8] sm:$0xf0]  ;;  %v2705_v37 = vor.u32 %v3685_v29, %v2702_v31 }
  0xaa   :  { %1895 = vmatpush.bf16.msrb.mxu0 %v3085_v56  ;;  %v3004_v51 = vld [vmem:[%s5749_s1 + $0x428] sm:$0xf]  ;;  %v3763_v52 = vld [vmem:[%s5749_s1 + $0x434] sm:$0xf0]  ;;  %v3405_v54 = vor.u32 %v3863_v46, %v3404_v45  ;;  %v3649_v40 = vld [vmem:[%s5749_s1 + $0xac] sm:$0xf] }
  0xab   :  { %1909 = vmatpush.bf16.msrb.mxu1 %v3213_v57  ;;  %v3132_v53 = vld [vmem:[%s5749_s1 + $0x528] sm:$0xf]  ;;  %v3795_v55 = vld [vmem:[%s5749_s1 + $0x534] sm:$0xf0]  ;;  %v3005_v61 = vor.u32 %v3763_v52, %v3004_v51  ;;  %v2558_v41 = vld [vmem:[%s5749_s1 + $0xb8] sm:$0xf0] }
  0xac   :  { %1923 = vmatpush.bf16.msrb.mxu2 %v3341_v59  ;;  %v3260_v56 = vld [vmem:[%s5749_s1 + $0x628] sm:$0xf]  ;;  %v3827_v57 = vld [vmem:[%s5749_s1 + $0x634] sm:$0xf0]  ;;  %v3133_v0 = vor.u32 %v3795_v55, %v3132_v53  ;;  %v3681_v42 = vld [vmem:[%s5749_s1 + $0x1ac] sm:$0xf]  ;;  %v2561_v52 = vor.u32 %v3649_v40, %v2558_v41 }
  0xad   :  { %1937 = vmatpush.bf16.msrb.mxu3 %v3469_v63  ;;  %v3388_v59 = vld [vmem:[%s5749_s1 + $0x728] sm:$0xf]  ;;  %v3859_v60 = vld [vmem:[%s5749_s1 + $0x734] sm:$0xf0]  ;;  %v3261_v2 = vor.u32 %v3827_v57, %v3260_v56  ;;  %v2686_v46 = vld [vmem:[%s5749_s1 + $0x1b8] sm:$0xf0] }
  0xae   :  { %1896 = vmatpush.bf16.msrb.mxu0 %v3069_v6  ;;  %v2988_v62 = vld [vmem:[%s5749_s1 + $0x408] sm:$0xf]  ;;  %v3759_v63 = vld [vmem:[%s5749_s1 + $0x414] sm:$0xf0]  ;;  %v3389_v6 = vor.u32 %v3859_v60, %v3388_v59  ;;  %v2942_v51 = vld [vmem:[%s5749_s1 + $0x3b8] sm:$0xf0]  ;;  %v2689_v53 = vor.u32 %v3681_v42, %v2686_v46 }
  0xaf   :  { %1910 = vmatpush.bf16.msrb.mxu1 %v3197_v7  ;;  %v3116_v3 = vld [vmem:[%s5749_s1 + $0x508] sm:$0xf]  ;;  %v3791_v4 = vld [vmem:[%s5749_s1 + $0x514] sm:$0xf0]  ;;  %v2989_v14 = vor.u32 %v3759_v63, %v2988_v62  ;;  %v3645_v55 = vld [vmem:[%s5749_s1 + $0x8c] sm:$0xf] }
  0xb0   :  { %1924 = vmatpush.bf16.msrb.mxu2 %v3325_v8  ;;  %v3244_v5 = vld [vmem:[%s5749_s1 + $0x608] sm:$0xf]  ;;  %v3823_v7 = vld [vmem:[%s5749_s1 + $0x614] sm:$0xf0]  ;;  %v3117_v19 = vor.u32 %v3791_v4, %v3116_v3  ;;  %v2542_v56 = vld [vmem:[%s5749_s1 + $0x98] sm:$0xf0]  ;;  %v5291_v3 = vpop.f32.mrf.mxu0 }
  0xb1   :  { %1938 = vmatpush.bf16.msrb.mxu3 %v3453_v13  ;;  %v3372_v8 = vld [vmem:[%s5749_s1 + $0x708] sm:$0xf]  ;;  %v3855_v9 = vld [vmem:[%s5749_s1 + $0x714] sm:$0xf0]  ;;  %v3689_v13 = vld [vmem:[%s5749_s1 + $0x1ec] sm:$0xf] }
  0xb2   :  { %1897 = vmatpush.bf16.msrb.mxu0 %v3053_v20  ;;  %v3245_v20 = vor.u32 %v3823_v7, %v3244_v5  ;;  %v3373_v23 = vor.u32 %v3855_v9, %v3372_v8  ;;  %v2721_v25 = vor.u32 %v3689_v13, %v2718_v15  ;;  %v3677_v57 = vld [vmem:[%s5749_s1 + $0x18c] sm:$0xf]  ;;  %v2670_v60 = vld [vmem:[%s5749_s1 + $0x198] sm:$0xf0]  ;;  %v5302_v9 = vpop.f32.mrf.mxu1 }
  0xb3   :  { %1911 = vmatpush.bf16.msrb.mxu1 %v3181_v21  ;;  %v3753_v21 = vld [vmem:[%s5749_s1 + $0x3ec] sm:$0xf]  ;;  %v2798_v62 = vld [vmem:[%s5749_s1 + $0x298] sm:$0xf0]  ;;  %v2673_v4 = vor.u32 %v3677_v57, %v2670_v60 }
  0xb4   :  { %1925 = vmatpush.bf16.msrb.mxu2 %v3309_v22  ;;  %v2974_v22 = vld [vmem:[%s5749_s1 + $0x3f8] sm:$0xf0]  ;;  %v3741_v63 = vld [vmem:[%s5749_s1 + $0x38c] sm:$0xf] }
  0xb5   :  { %1939 = vmatpush.bf16.msrb.mxu3 %v3437_v26  ;;  %v2849_v26 = vor.u32 %v3721_v16, %v2846_v18  ;;  %v2977_v30 = vor.u32 %v3753_v21, %v2974_v22  ;;  %v2526_v7 = vld [vmem:[%s5749_s1 + $0x78] sm:$0xf0]  ;;  %v3673_v8 = vld [vmem:[%s5749_s1 + $0x16c] sm:$0xf] }
  0xb6   :  { %1898 = vmatpush.bf16.msrb.mxu0 %v3037_v32  ;;  %v3717_v32 = vld [vmem:[%s5749_s1 + $0x2cc] sm:$0xf]  ;;  %v2654_v12 = vld [vmem:[%s5749_s1 + $0x178] sm:$0xf0] }
  0xb7   :  { %1912 = vmatpush.bf16.msrb.mxu1 %v3165_v33  ;;  %v2830_v33 = vld [vmem:[%s5749_s1 + $0x2d8] sm:$0xf0]  ;;  %v3705_v13 = vld [vmem:[%s5749_s1 + $0x26c] sm:$0xf] }
  0xb8   :  { %1926 = vmatpush.bf16.msrb.mxu2 %v3293_v34  ;;  %v3749_v34 = vld [vmem:[%s5749_s1 + $0x3cc] sm:$0xf]  ;;  %v2910_v16 = vld [vmem:[%s5749_s1 + $0x378] sm:$0xf0] }
  0xb9   :  { %1940 = vmatpush.bf16.msrb.mxu3 %v3421_v38  ;;  %v2833_v38 = vor.u32 %v3717_v32, %v2830_v33  ;;  %v2961_v45 = vor.u32 %v3749_v34, %v2958_v35  ;;  %v3737_v15 = vld [vmem:[%s5749_s1 + $0x36c] sm:$0xf]  ;;  %v2510_v22 = vld [vmem:[%s5749_s1 + $0x58] sm:$0xf0]  ;;  %v5345_v32 = vpop.f32.mrf.mxu3 }
  0xba   :  { %1899 = vmatpush.bf16.msrb.mxu0 %v3021_v48  ;;  %v3713_v48 = vld [vmem:[%s5749_s1 + $0x2ac] sm:$0xf]  ;;  %v2766_v27 = vld [vmem:[%s5749_s1 + $0x258] sm:$0xf0] }
  0xbb   :  { %1913 = vmatpush.bf16.msrb.mxu1 %v3149_v49  ;;  %v2814_v49 = vld [vmem:[%s5749_s1 + $0x2b8] sm:$0xf0]  ;;  %v3637_v21 = vld [vmem:[%s5749_s1 + $0x4c] sm:$0xf] }
  0xbc   :  { %1927 = vmatpush.bf16.msrb.mxu2 %v3277_v50  ;;  %v3745_v50 = vld [vmem:[%s5749_s1 + $0x3ac] sm:$0xf]  ;;  %v2894_v29 = vld [vmem:[%s5749_s1 + $0x358] sm:$0xf0]  ;;  %v2513_v31 = vor.u32 %v3637_v21, %v2510_v22 }
  0xbd   :  { %1941 = vmatpush.bf16.msrb.mxu3 %v3405_v54  ;;  %v2817_v54 = vor.u32 %v3713_v48, %v2814_v49  ;;  %v2945_v59 = vor.u32 %v3745_v50, %v2942_v51  ;;  %v3733_v28 = vld [vmem:[%s5749_s1 + $0x34c] sm:$0xf]  ;;  %v2622_v40 = vld [vmem:[%s5749_s1 + $0x138] sm:$0xf0]  ;;  %v5373_v49 = vpop.f32.mrf.mxu1 }
  0xbe   :  { %1900 = vmatpush.bf16.msrb.mxu0 %v3005_v61  ;;  %v3709_v61 = vld [vmem:[%s5749_s1 + $0x28c] sm:$0xf]  ;;  %v2750_v42 = vld [vmem:[%s5749_s1 + $0x238] sm:$0xf0] }
  0xbf   :  { %1914 = vmatpush.bf16.msrb.mxu1 %v3133_v0  ;;  %v2926_v0 = vld [vmem:[%s5749_s1 + $0x398] sm:$0xf0]  ;;  %v2801_v5 = vor.u32 %v3709_v61, %v2798_v62  ;;  %v3633_v35 = vld [vmem:[%s5749_s1 + $0x2c] sm:$0xf] }
  0xc0   :  { %1928 = vmatpush.bf16.msrb.mxu2 %v3261_v2  ;;  %v2545_v2 = vor.u32 %v3645_v55, %v2542_v56  ;;  %v2929_v11 = vor.u32 %v3741_v63, %v2926_v0  ;;  %v3697_v41 = vld [vmem:[%s5749_s1 + $0x22c] sm:$0xf]  ;;  %v2878_v48 = vld [vmem:[%s5749_s1 + $0x338] sm:$0xf0] }
  0xc1   :  { %1942 = vmatpush.bf16.msrb.mxu3 %v3389_v6  ;;  %v3641_v6 = vld [vmem:[%s5749_s1 + $0x6c] sm:$0xf]  ;;  %v2606_v56 = vld [vmem:[%s5749_s1 + $0x118] sm:$0xf0] }
  0xc2   :  { %1901 = vmatpush.bf16.msrb.mxu0 %v2989_v14  ;;  %v2782_v14 = vld [vmem:[%s5749_s1 + $0x278] sm:$0xf0]  ;;  %v2529_v18 = vor.u32 %v3641_v6, %v2526_v7  ;;  %v3729_v46 = vld [vmem:[%s5749_s1 + $0x32c] sm:$0xf] }
  0xc3   :  { %1915 = vmatpush.bf16.msrb.mxu1 %v3117_v19  ;;  %v2657_v19 = vor.u32 %v3673_v8, %v2654_v12  ;;  %v3629_v51 = vld [vmem:[%s5749_s1 + $0xc] sm:$0xf]  ;;  %v2734_v60 = vld [vmem:[%s5749_s1 + $0x218] sm:$0xf0] }
  0xc4   :  { %1929 = vmatpush.bf16.msrb.mxu2 %v3245_v20  ;;  %v2785_v20 = vor.u32 %v3705_v13, %v2782_v14  ;;  %v3661_v55 = vld [vmem:[%s5749_s1 + $0x10c] sm:$0xf]  ;;  %v2862_v62 = vld [vmem:[%s5749_s1 + $0x318] sm:$0xf0] }
  0xc5   :  { %1943 = vmatpush.bf16.msrb.mxu3 %v3373_v23  ;;  %1902 = vmatmul.bf16.vlgmr.msrb.gmra.mxu0 %v4432_v39  ;;  %v3669_v23 = vld [vmem:[%s5749_s1 + $0x14c] sm:$0xf]  ;;  %v3102_v0 = vld [vmem:[%s5749_s1 + $0x4f8] sm:$0xf0]  ;;  %v2609_v8 = vor.u32 %v3661_v55, %v2606_v56 }
  0xc6   :  { %1950 = vmatpush.bf16.msra.mxu0 %v2593_v24  ;;  %1916 = vmatmul.bf16.vlgmr.msrb.gmra.mxu1 %v4445_v44  ;;  %v2913_v24 = vor.u32 %v3737_v15, %v2910_v16  ;;  %v3693_v57 = vld [vmem:[%s5749_s1 + $0x20c] sm:$0xf]  ;;  %v3358_v7 = vld [vmem:[%s5749_s1 + $0x6f8] sm:$0xf0] }
  0xc7   :  { %1964 = vmatpush.bf16.msra.mxu1 %v2721_v25  ;;  %1930 = vmatmul.bf16.vlgmr.msrb.gmra.mxu2 %v4443_v43  ;;  %v2638_v25 = vld [vmem:[%s5749_s1 + $0x158] sm:$0xf0]  ;;  %v3725_v61 = vld [vmem:[%s5749_s1 + $0x30c] sm:$0xf] }
  0xc8   :  { %1978 = vmatpush.bf16.msra.mxu2 %v2849_v26  ;;  %1944 = vmatmul.bf16.vlgmr.msrb.gmra.mxu3 %v4453_v47  ;;  %v3701_v26 = vld [vmem:[%s5749_s1 + $0x24c] sm:$0xf]  ;;  %v2641_v33 = vor.u32 %v3669_v23, %v2638_v25  ;;  %v3486_v13 = vld [vmem:[%s5749_s1 + $0x7f8] sm:$0xf0]  ;;  %v2865_v15 = vor.u32 %v3725_v61, %v2862_v62 }
  0xc9   :  { %1992 = vmatpush.bf16.msra.mxu3 %v2977_v30  ;;  %v5343_v30 = vpop.f32.mrf.mxu2  ;;  %v2769_v34 = vor.u32 %v3701_v26, %v2766_v27  ;;  %v3785_v63 = vld [vmem:[%s5749_s1 + $0x4ec] sm:$0xf]  ;;  %v3086_v22 = vld [vmem:[%s5749_s1 + $0x4d8] sm:$0xf0] }
  0xca   :  { %1951 = vmatpush.bf16.msra.mxu0 %v2577_v36  ;;  %v2494_v36 = vld [vmem:[%s5749_s1 + $0x38] sm:$0xf0]  ;;  %v3849_v6 = vld [vmem:[%s5749_s1 + $0x6ec] sm:$0xf]  ;;  %v3105_v16 = vor.u32 %v3785_v63, %v3102_v0 }
  0xcb   :  { %1965 = vmatpush.bf16.msra.mxu1 %v2705_v37  ;;  %v3665_v37 = vld [vmem:[%s5749_s1 + $0x12c] sm:$0xf]  ;;  %v2497_v50 = vor.u32 %v3633_v35, %v2494_v36  ;;  %v3214_v25 = vld [vmem:[%s5749_s1 + $0x5d8] sm:$0xf0] }
  0xcc   :  { %1979 = vmatpush.bf16.msra.mxu2 %v2833_v38  ;;  %v2897_v38 = vor.u32 %v3733_v28, %v2894_v29  ;;  %v3881_v12 = vld [vmem:[%s5749_s1 + $0x7ec] sm:$0xf]  ;;  %v3342_v27 = vld [vmem:[%s5749_s1 + $0x6d8] sm:$0xf0] }
  0xcd   :  { %1993 = vmatpush.bf16.msra.mxu3 %v2961_v45  ;;  %v5365_v45 = vpop.f32.mrf.mxu0  ;;  %v3781_v21 = vld [vmem:[%s5749_s1 + $0x4cc] sm:$0xf]  ;;  %v3054_v55 = vld [vmem:[%s5749_s1 + $0x498] sm:$0xf0] }
  0xce   :  { %1952 = vmatpush.bf16.msra.mxu0 %v2561_v52  ;;  %v2478_v52 = vld [vmem:[%s5749_s1 + $0x18] sm:$0xf0]  ;;  %v3813_v23 = vld [vmem:[%s5749_s1 + $0x5cc] sm:$0xf] }
  0xcf   :  { %1966 = vmatpush.bf16.msra.mxu1 %v2689_v53  ;;  %v2625_v53 = vor.u32 %v3665_v37, %v2622_v40  ;;  %v3845_v26 = vld [vmem:[%s5749_s1 + $0x6cc] sm:$0xf]  ;;  %v3217_v35 = vor.u32 %v3813_v23, %v3214_v25  ;;  %v3182_v56 = vld [vmem:[%s5749_s1 + $0x598] sm:$0xf0] }
  0xd0   :  { %1980 = vmatpush.bf16.msra.mxu2 %v2817_v54  ;;  %v2753_v54 = vor.u32 %v3697_v41, %v2750_v42  ;;  %v3877_v29 = vld [vmem:[%s5749_s1 + $0x7cc] sm:$0xf]  ;;  %v3345_v36 = vor.u32 %v3845_v26, %v3342_v27  ;;  %v3198_v42 = vld [vmem:[%s5749_s1 + $0x5b8] sm:$0xf0] }
  0xd1   :  { %1994 = vmatpush.bf16.msra.mxu3 %v2945_v59  ;;  %v2881_v59 = vor.u32 %v3729_v46, %v2878_v48  ;;  %v5423_v14 = vpop.f32.mrf.mxu2  ;;  %v3777_v37 = vld [vmem:[%s5749_s1 + $0x4ac] sm:$0xf]  ;;  %v3326_v48 = vld [vmem:[%s5749_s1 + $0x6b8] sm:$0xf0] }
  0xd2   :  { %1953 = vmatpush.bf16.msra.mxu0 %v2545_v2  ;;  %v3817_v2 = vld [vmem:[%s5749_s1 + $0x5ec] sm:$0xf]  ;;  %v3438_v62 = vld [vmem:[%s5749_s1 + $0x798] sm:$0xf0] }
  0xd3   :  { %1967 = vmatpush.bf16.msra.mxu1 %v2673_v4  ;;  %v2481_v4 = vor.u32 %v3629_v51, %v2478_v52  ;;  %v3809_v40 = vld [vmem:[%s5749_s1 + $0x5ac] sm:$0xf]  ;;  %v3150_v27 = vld [vmem:[%s5749_s1 + $0x558] sm:$0xf0] }
  0xd4   :  { %1981 = vmatpush.bf16.msra.mxu2 %v2801_v5  ;;  %v3230_v5 = vld [vmem:[%s5749_s1 + $0x5f8] sm:$0xf0]  ;;  %v3841_v46 = vld [vmem:[%s5749_s1 + $0x6ac] sm:$0xf]  ;;  %v3201_v52 = vor.u32 %v3809_v40, %v3198_v42 }
  0xd5   :  { %1995 = vmatpush.bf16.msra.mxu3 %v2929_v11  ;;  %v2737_v11 = vor.u32 %v3693_v57, %v2734_v60  ;;  %v5445_v28 = vpop.f32.mrf.mxu0  ;;  %v3837_v57 = vld [vmem:[%s5749_s1 + $0x68c] sm:$0xf] }
  0xd6   :  { %1954 = vmatpush.bf16.msra.mxu0 %v2529_v18  ;;  %v5425_v18 = vpop.f32.mrf.mxu3  ;;  %v3869_v61 = vld [vmem:[%s5749_s1 + $0x78c] sm:$0xf] }
  0xd7   :  { %1968 = vmatpush.bf16.msra.mxu1 %v2657_v19  ;;  %v3233_v19 = vor.u32 %v3817_v2, %v3230_v5  ;;  %v3769_v5 = vld [vmem:[%s5749_s1 + $0x46c] sm:$0xf] }
  0xd8   :  { %1982 = vmatpush.bf16.msra.mxu2 %v2785_v20  ;;  %v3361_v20 = vor.u32 %v3849_v6, %v3358_v7  ;;  %v3038_v6 = vld [vmem:[%s5749_s1 + $0x478] sm:$0xf0]  ;;  %v3801_v7 = vld [vmem:[%s5749_s1 + $0x56c] sm:$0xf] }
  0xd9   :  { %1996 = vmatpush.bf16.msra.mxu3 %v2913_v24  ;;  %v3489_v24 = vor.u32 %v3881_v12, %v3486_v13  ;;  %v3166_v12 = vld [vmem:[%s5749_s1 + $0x578] sm:$0xf0]  ;;  %v3833_v13 = vld [vmem:[%s5749_s1 + $0x66c] sm:$0xf] }
  0xda   :  { %1955 = vmatpush.bf16.msra.mxu0 %v2513_v31  ;;  %v3470_v31 = vld [vmem:[%s5749_s1 + $0x7d8] sm:$0xf0]  ;;  %v3765_v23 = vld [vmem:[%s5749_s1 + $0x44c] sm:$0xf] }
  0xdb   :  { %1969 = vmatpush.bf16.msra.mxu1 %v2641_v33  ;;  %v5453_v33 = vpop.f32.mrf.mxu1  ;;  %v3473_v41 = vor.u32 %v3877_v29, %v3470_v31  ;;  %v3797_v25 = vld [vmem:[%s5749_s1 + $0x54c] sm:$0xf]  ;;  %v3278_v31 = vld [vmem:[%s5749_s1 + $0x658] sm:$0xf0] }
  0xdc   :  { %1983 = vmatpush.bf16.msra.mxu2 %v2769_v34  ;;  %v3089_v34 = vor.u32 %v3781_v21, %v3086_v22  ;;  %v3169_v21 = vor.u32 %v3801_v7, %v3166_v12  ;;  %v3829_v29 = vld [vmem:[%s5749_s1 + $0x64c] sm:$0xf] }
  0xdd   :  { %1997 = vmatpush.bf16.msra.mxu3 %v2897_v38  ;;  %v3070_v38 = vld [vmem:[%s5749_s1 + $0x4b8] sm:$0xf0]  ;;  %v5511_v0 = vpop.f32.mrf.mxu0  ;;  %v3281_v42 = vor.u32 %v3829_v29, %v3278_v31  ;;  %v3821_v7 = vld [vmem:[%s5749_s1 + $0x60c] sm:$0xf] }
  0xde   :  { %1956 = vmatpush.bf16.msra.mxu0 %v2497_v50  ;;  %v3873_v50 = vld [vmem:[%s5749_s1 + $0x7ac] sm:$0xf]  ;;  %v3073_v51 = vor.u32 %v3777_v37, %v3070_v38  ;;  %v5503_v60 = vpop.f32.mrf.mxu3 }
  0xdf   :  { %1970 = vmatpush.bf16.msra.mxu1 %v2625_v53  ;;  %v3329_v53 = vor.u32 %v3841_v46, %v3326_v48  ;;  %v3761_v48 = vld [vmem:[%s5749_s1 + $0x42c] sm:$0xf] }
  0xe0   :  { %1984 = vmatpush.bf16.msra.mxu2 %v2753_v54  ;;  %v3773_v54 = vld [vmem:[%s5749_s1 + $0x48c] sm:$0xf] }
  0xe1   :  { %1998 = vmatpush.bf16.msra.mxu3 %v2881_v59  ;;  %v3310_v59 = vld [vmem:[%s5749_s1 + $0x698] sm:$0xf0]  ;;  %v3057_v63 = vor.u32 %v3773_v54, %v3054_v55  ;;  %v3853_v12 = vld [vmem:[%s5749_s1 + $0x70c] sm:$0xf] }
  0xe2   :  { %1957 = vmatpush.bf16.msra.mxu0 %v2481_v4  ;;  %v3313_v4 = vor.u32 %v3837_v57, %v3310_v59  ;;  %v3262_v54 = vld [vmem:[%s5749_s1 + $0x638] sm:$0xf0] }
  0xe3   :  { %1971 = vmatpush.bf16.msra.mxu1 %v2609_v8  ;;  %v5522_v8 = vpop.f32.mrf.mxu1 }
  0xe4   :  { %1985 = vmatpush.bf16.msra.mxu2 %v2737_v11  ;;  %v3441_v11 = vor.u32 %v3869_v61, %v3438_v62 }
  0xe5   :  { %1999 = vmatpush.bf16.msra.mxu3 %v2865_v15  ;;  %1958 = vmatmul.bf16.vlgmr.msra.gmra.mxu0 %v4210_v58  ;;  %v3805_v58 = vld [vmem:[%s5749_s1 + $0x58c] sm:$0xf]  ;;  %v3294_v15 = vld [vmem:[%s5749_s1 + $0x678] sm:$0xf0]  ;;  %v1735_v46 = vpop.f32.mrf.mxu0 }
  0xe6   :  { %2006 = vmatpush.bf16.msrb.mxu0 %v3105_v16  ;;  %1972 = vmatmul.bf16.vlgmr.msra.gmra.mxu1 %v4246_v10  ;;  %v3185_v2 = vor.u32 %v3805_v58, %v3182_v56  ;;  %v3865_v16 = vld [vmem:[%s5749_s1 + $0x76c] sm:$0xf]  ;;  %v3297_v22 = vor.u32 %v3833_v13, %v3294_v15  ;;  %v5570_v40 = vpop.f32.mrf.mxu3  ;;  %v3374_v13 = vld [vmem:[%s5749_s1 + $0x718] sm:$0xf0] }
  0xe7   :  { %2020 = vmatpush.bf16.msrb.mxu1 %v3233_v19  ;;  %1986 = vmatmul.bf16.vlgmr.msra.gmra.mxu2 %v4224_v1  ;;  %v3454_v1 = vld [vmem:[%s5749_s1 + $0x7b8] sm:$0xf0]  ;;  %v3857_v58 = vld [vmem:[%s5749_s1 + $0x72c] sm:$0xf] }
  0xe8   :  { %2034 = vmatpush.bf16.msrb.mxu2 %v3361_v20  ;;  %2000 = vmatmul.bf16.vlgmr.msra.gmra.mxu3 %v4260_v17  ;;  %v5492_v17 = vpop.f32.mrf.mxu2  ;;  %v3457_v10 = vor.u32 %v3873_v50, %v3454_v1  ;;  %v3422_v19 = vld [vmem:[%s5749_s1 + $0x778] sm:$0xf0]  ;;  %v3041_v20 = vor.u32 %v3769_v5, %v3038_v6  ;;  %v3793_v1 = vld [vmem:[%s5749_s1 + $0x52c] sm:$0xf] }
  0xe9   :  { %2048 = vmatpush.bf16.msrb.mxu3 %v3489_v24  ;;  %v3022_v24 = vld [vmem:[%s5749_s1 + $0x458] sm:$0xf0]  ;;  %v3425_v26 = vor.u32 %v3865_v16, %v3422_v19 }
  0xea   :  { %2007 = vmatpush.bf16.msrb.mxu0 %v3089_v34  ;;  %v3861_v34 = vld [vmem:[%s5749_s1 + $0x74c] sm:$0xf]  ;;  %v3025_v38 = vor.u32 %v3765_v23, %v3022_v24  ;;  %v3006_v50 = vld [vmem:[%s5749_s1 + $0x438] sm:$0xf0] }
  0xeb   :  { %2021 = vmatpush.bf16.msrb.mxu1 %v3217_v35  ;;  %v3406_v35 = vld [vmem:[%s5749_s1 + $0x758] sm:$0xf0]  ;;  %v1749_v55 = vpop.f32.mrf.mxu1  ;;  %v3009_v59 = vor.u32 %v3761_v48, %v3006_v50 }
  0xec   :  { %2035 = vmatpush.bf16.msrb.mxu2 %v3345_v36  ;;  %v5566_v36 = vld [vmem:[%s5751_s2] sm:$0xf]  ;;  %v3118_v6 = vld [vmem:[%s5749_s1 + $0x518] sm:$0xf0] }
  0xed   :  { %2049 = vmatpush.bf16.msrb.mxu3 %v3473_v41  ;;  %v3153_v41 = vor.u32 %v3797_v25, %v3150_v27  ;;  %v286_v56 = vperm.slane %v5566_v36, 0  ;;  %v287_v57 = vperm.slane %v5566_v36, 1  ;;  %v3377_v25 = vor.u32 %v3853_v12, %v3374_v13  ;;  %v1737_v27 = vpop.f32.mrf.mxu0  ;;  %v3893_v13 = vld [vmem:[%s5752_s3 + $0x48] sm:$0xff] }
  0xee   :  { %2008 = vmatpush.bf16.msrb.mxu0 %v3073_v51  ;;  %v3409_v51 = vor.u32 %v3861_v34, %v3406_v35  ;;  %v1777_v24 = vpop.f32.mrf.mxu3  ;;  %v3890_v35 = vld [vmem:[%s5752_s3 + $0x30] sm:$0xff] }
  0xef   :  { %2022 = vmatpush.bf16.msrb.mxu1 %v3201_v52  ;;  %v3134_v52 = vld [vmem:[%s5749_s1 + $0x538] sm:$0xf0]  ;;  %v1624_v15 = vadd.f32 %v5291_v3, %v286_v56  ;;  %v1626_v16 = vadd.f32 %v5365_v45, %v286_v56 }
  0xf0   :  { %2036 = vmatpush.bf16.msrb.mxu2 %v3329_v53  ;;  %v5568_v37 = vpop.f32.mrf.mxu2  ;;  %v3825_v53 = vld [vmem:[%s5749_s1 + $0x62c] sm:$0xf]  ;;  %v3137_v61 = vor.u32 %v3793_v1, %v3134_v52  ;;  %v3899_v3 = vld [vmem:[%s5752_s3 + $0x78] sm:$0xff] }
  0xf1   :  { %2050 = vmatpush.bf16.msrb.mxu3 %v3457_v10  ;;  %v3390_v10 = vld [vmem:[%s5749_s1 + $0x738] sm:$0xf0]  ;;  %v3265_v62 = vor.u32 %v3825_v53, %v3262_v54  ;;  %v1638_v29 = vadd.f32 %v5302_v9, %v1624_v15  ;;  %v1640_v31 = vadd.f32 %v5373_v49, %v1626_v16  ;;  %v3896_v53 = vld [vmem:[%s5752_s3 + $0x60] sm:$0xff] }
  0xf2   :  { %2009 = vmatpush.bf16.msrb.mxu0 %v3057_v63  ;;  %v3757_v63 = vld [vmem:[%s5749_s1 + $0x40c] sm:$0xf]  ;;  %v3393_v5 = vor.u32 %v3857_v58, %v3390_v10  ;;  %v3895_v10 = vld [vmem:[%s5752_s3 + $0x58] sm:$0xff] }
  0xf3   :  { %2023 = vmatpush.bf16.msrb.mxu1 %v3185_v2  ;;  %v2990_v2 = vld [vmem:[%s5749_s1 + $0x418] sm:$0xf0]  ;;  %v1751_v45 = vpop.f32.mrf.mxu1  ;;  %v1652_v9 = vadd.f32 %v5343_v30, %v1638_v29  ;;  %v1654_v49 = vadd.f32 %v5423_v14, %v1640_v31 }
  0xf4   :  { %2037 = vmatpush.bf16.msrb.mxu2 %v3313_v4  ;;  %v3789_v4 = vld [vmem:[%s5749_s1 + $0x50c] sm:$0xf]  ;;  %v2993_v19 = vor.u32 %v3757_v63, %v2990_v2  ;;  %v3886_v63 = vld [vmem:[%s5752_s3 + $0x10] sm:$0xff]  ;;  %v3903_v29 = vld [vmem:[%s5752_s3 + $0x98] sm:$0xff] }
  0xf5   :  { %2051 = vmatpush.bf16.msrb.mxu3 %v3441_v11  ;;  %v3246_v11 = vld [vmem:[%s5749_s1 + $0x618] sm:$0xf0]  ;;  %v1668_v30 = vadd.f32 %v5425_v18, %v1654_v49 }
  0xf6   :  { %2010 = vmatpush.bf16.msrb.mxu0 %v3041_v20  ;;  %v3249_v23 = vor.u32 %v3821_v7, %v3246_v11  ;;  %v1779_v50 = vpop.f32.mrf.mxu3  ;;  %v3887_v18 = vld [vmem:[%s5752_s3 + $0x18] sm:$0xff] }
  0xf7   :  { %2024 = vmatpush.bf16.msrb.mxu1 %v3169_v21  ;;  %v1736_v21 = vadd.f32 %v1735_v46, %v287_v57 }
  0xf8   :  { %2038 = vmatpush.bf16.msrb.mxu2 %v3297_v22  ;;  %v1763_v20 = vpop.f32.mrf.mxu2  ;;  %v3121_v22 = vor.u32 %v3789_v4, %v3118_v6 }
  0xf9   :  { %2052 = vmatpush.bf16.msrb.mxu3 %v3425_v26  ;;  %v3891_v26 = vld [vmem:[%s5752_s3 + $0x38] sm:$0xff]  ;;  %v1750_v34 = vadd.f32 %v1749_v55, %v1736_v21  ;;  %v3884_v21 = vld [vmem:[%s5752_s3] sm:$0xff] }
  0xfa   :  { %2011 = vmatpush.bf16.msrb.mxu0 %v3025_v38  ;;  %v1738_v38 = vadd.f32 %v1737_v27, %v287_v57 }
  0xfb   :  { %2025 = vmatpush.bf16.msrb.mxu1 %v3153_v41  ;;  %v3898_v41 = vld [vmem:[%s5752_s3 + $0x70] sm:$0xff] }
  0xfc   :  { %2039 = vmatpush.bf16.msrb.mxu2 %v3281_v42  ;;  %v1764_v42 = vadd.f32 %v1763_v20, %v1750_v34  ;;  %v1752_v48 = vadd.f32 %v1751_v45, %v1738_v38  ;;  %v3904_v45 = vld [vmem:[%s5752_s3 + $0xa0] sm:$0xff]  ;;  %v3902_v34 = vld [vmem:[%s5752_s3 + $0x90] sm:$0xff]  ;;  %v288_v38 = vperm.slane %v5566_v36, 2 }
  0xfd   :  { %2053 = vmatpush.bf16.msrb.mxu3 %v3409_v51 }
  0xfe   :  { %2012 = vmatpush.bf16.msrb.mxu0 %v3009_v59  ;;  %v1778_v14 = vadd.f32 %v1777_v24, %v1764_v42 }
  0xff   :  { %2026 = vmatpush.bf16.msrb.mxu1 %v3137_v61 }
 0x100   :  { %2040 = vmatpush.bf16.msrb.mxu2 %v3265_v62  ;;  %v1765_v46 = vpop.f32.mrf.mxu2  ;;  %v3907_v62 = vld [vmem:[%s5752_s3 + $0xb8] sm:$0xff] }
 0x101   :  { %2054 = vmatpush.bf16.msrb.mxu3 %v3393_v5  ;;  %v1766_v52 = vadd.f32 %v1765_v46, %v1752_v48 }
 0x102   :  { %2013 = vmatpush.bf16.msrb.mxu0 %v2993_v19  ;;  %v1791_v1 = vpop.f32.mrf.mxu0 }
 0x103   :  { %2027 = vmatpush.bf16.msrb.mxu1 %v3121_v22  ;;  %v1805_v51 = vpop.f32.mrf.mxu1  ;;  %v1792_v55 = vadd.f32 %v1791_v1, %v1778_v14  ;;  %v1780_v58 = vadd.f32 %v1779_v50, %v1766_v52 }
 0x104   :  { %2041 = vmatpush.bf16.msrb.mxu2 %v3249_v23  ;;  %v3892_v23 = vld [vmem:[%s5752_s3 + $0x40] sm:$0xff] }
 0x105   :  { %2055 = vmatpush.bf16.msrb.mxu3 %v3377_v25  ;;  %2014 = vmatmul.bf16.vlgmr.msrb.gmra.mxu0 %v4432_v39  ;;  %v3889_v39 = vld [vmem:[%s5752_s3 + $0x28] sm:$0xff] }
 0x106   :  { %2334 = vmatpush.bf16.msra.mxu0 %v3891_v26  ;;  %2028 = vmatmul.bf16.vlgmr.msrb.gmra.mxu1 %v4445_v44  ;;  %v1666_v44 = vadd.f32 %v5345_v32, %v1652_v9  ;;  %v1682_v32 = vadd.f32 %v5511_v0, %v1668_v30 }
 0x107   :  { %2348 = vmatpush.bf16.msra.mxu1 %v3899_v3  ;;  %2042 = vmatmul.bf16.vlgmr.msrb.gmra.mxu2 %v4443_v43  ;;  %v3897_v43 = vld [vmem:[%s5752_s3 + $0x68] sm:$0xff] }
 0x108   :  { %2056 = vmatmul.bf16.vlgmr.msrb.gmra.mxu3 %v4453_v47  ;;  %v3888_v47 = vld [vmem:[%s5752_s3 + $0x20] sm:$0xff]  ;;  %v1680_v54 = vadd.f32 %v5445_v28, %v1666_v44  ;;  %v1696_v59 = vadd.f32 %v5522_v8, %v1682_v32  ;;  %v1806_v28 = vadd.f32 %v1805_v51, %v1792_v55  ;;  %2362 = vmatpush.bf16.msra.mxu2 %v3907_v62  ;;  %v3906_v8 = vld [vmem:[%s5752_s3 + $0xb0] sm:$0xff]  ;;  %v3905_v3 = vld [vmem:[%s5752_s3 + $0xa8] sm:$0xff] }
 0x10a   :  { %2335 = vmatpush.bf16.msra.mxu0 %v3890_v35  ;;  %v1819_v56 = vpop.f32.mrf.mxu2  ;;  %v1694_v57 = vadd.f32 %v5453_v33, %v1680_v54  ;;  %v1793_v61 = vpop.f32.mrf.mxu0  ;;  %v1710_v2 = vadd.f32 %v5568_v37, %v1696_v59  ;;  %v3894_v33 = vld [vmem:[%s5752_s3 + $0x50] sm:$0xff]  ;;  %v3885_v37 = vld [vmem:[%s5752_s3 + $0x8] sm:$0xff] }
 0x10b   :  { %2349 = vmatpush.bf16.msra.mxu1 %v3898_v41  ;;  %v1833_v0 = vpop.f32.mrf.mxu3  ;;  %v1794_v4 = vadd.f32 %v1793_v61, %v1780_v58  ;;  %v1807_v5 = vpop.f32.mrf.mxu1  ;;  %v1820_v7 = vadd.f32 %v1819_v56, %v1806_v28  ;;  %v3901_v41 = vld [vmem:[%s5752_s3 + $0x88] sm:$0xff] }
 0x10c   :  { %v1708_v6 = vadd.f32 %v5492_v17, %v1694_v57  ;;  %v1724_v11 = vadd.f32 %v5570_v40, %v1710_v2  ;;  %2363 = vmatpush.bf16.msra.mxu2 %v3906_v8 }
 0x10d   :  { %v1808_v12 = vadd.f32 %v1807_v5, %v1794_v4  ;;  %v1834_v19 = vadd.f32 %v1833_v0, %v1820_v7  ;;  %v3915_v0 = vld [vmem:[%s5752_s3 + $0xf8] sm:$0xff]  ;;  %v3914_v4 = vld [vmem:[%s5752_s3 + $0xf0] sm:$0xff]  ;;  %v3913_v7 = vld [vmem:[%s5752_s3 + $0xe8] sm:$0xff] }
 0x10e   :  { %2336 = vmatpush.bf16.msra.mxu0 %v3889_v39  ;;  %v1722_v16 = vadd.f32 %v5503_v60, %v1708_v6  ;;  %v2066_v22 = vmax.f32 %v1724_v11, 0.0  ;;  %v3900_v39 = vld [vmem:[%s5752_s3 + $0x80] sm:$0xff]  ;;  %2376 = vmatpush.bf16.msra.mxu3 %v3915_v0  ;;  %v3911_v11 = vld [vmem:[%s5752_s3 + $0xd8] sm:$0xff] }
 0x10f   :  { %2350 = vmatpush.bf16.msra.mxu1 %v3897_v43  ;;  %v2063_v25 = vmax.f32 %v1834_v19, 0.0  ;;  %v289_v19 = vperm.slane %v5566_v36, 3 }
 0x110   :  { %v2062_v24 = vmax.f32 %v1722_v16, 0.0  ;;  %2364 = vmatpush.bf16.msra.mxu2 %v3905_v3 }
 0x112   :  { %2337 = vmatpush.bf16.msra.mxu0 %v3888_v47  ;;  %v1821_v15 = vpop.f32.mrf.mxu2  ;;  %v2070_v60 = vpack.c.bf16 %v2066_v22, %v2062_v24  ;;  %2377 = vmatpush.bf16.msra.mxu3 %v3914_v4 }
 0x113   :  { %2351 = vmatpush.bf16.msra.mxu1 %v3896_v53  ;;  %v1822_v17 = vadd.f32 %v1821_v15, %v1808_v12  ;;  %v1835_v20 = vpop.f32.mrf.mxu3  ;;  %v3910_v12 = vld [vmem:[%s5752_s3 + $0xd0] sm:$0xff]  ;;  %v3909_v15 = vld [vmem:[%s5752_s3 + $0xc8] sm:$0xff] }
 0x114   :  { %2365 = vmatpush.bf16.msra.mxu2 %v3904_v45 }
 0x115   :  { %v1836_v40 = vadd.f32 %v1835_v20, %v1822_v17  ;;  %v3908_v17 = vld [vmem:[%s5752_s3 + $0xc0] sm:$0xff] }
 0x116   :  { %2338 = vmatpush.bf16.msra.mxu0 %v3887_v18  ;;  %2378 = vmatpush.bf16.msra.mxu3 %v3913_v7 }
 0x117   :  { %2352 = vmatpush.bf16.msra.mxu1 %v3895_v10  ;;  %v2067_v26 = vmax.f32 %v1836_v40, 0.0 }
 0x118   :  { %2366 = vmatpush.bf16.msra.mxu2 %v3903_v29 }
 0x119   :  { %v2071_v27 = vpack.c.bf16 %v2067_v26, %v2063_v25 }
 0x11a   :  { %2339 = vmatpush.bf16.msra.mxu0 %v3886_v63 }
 0x11b   :  { %2353 = vmatpush.bf16.msra.mxu1 %v3894_v33 }
 0x11c   :  { %2367 = vmatpush.bf16.msra.mxu2 %v3902_v34 }
 0x11e   :  { %2340 = vmatpush.bf16.msra.mxu0 %v3885_v37  ;;  %v3912_v37 = vld [vmem:[%s5752_s3 + $0xe0] sm:$0xff] }
 0x11f   :  { %2354 = vmatpush.bf16.msra.mxu1 %v3893_v13  ;;  %2379 = vmatpush.bf16.msra.mxu3 %v3912_v37 }
 0x120   :  { %2368 = vmatpush.bf16.msra.mxu2 %v3901_v41 }
 0x122   :  { %2341 = vmatpush.bf16.msra.mxu0 %v3884_v21  ;;  %v1847_v31 = vpop.f32.mrf.mxu0 }
 0x123   :  { %2355 = vmatpush.bf16.msra.mxu1 %v3892_v23  ;;  %v1861_v35 = vpop.f32.mrf.mxu1  ;;  %v1848_v49 = vadd.f32 %v1847_v31, %v288_v38  ;;  %2380 = vmatpush.bf16.msra.mxu3 %v3911_v11 }
 0x124   :  { %2369 = vmatpush.bf16.msra.mxu2 %v3900_v39 }
 0x125   :  { %2342 = vmatmul.bf16.vlgmr.msra.gmra.mxu0 %v2070_v60  ;;  %v1862_v50 = vadd.f32 %v1861_v35, %v1848_v49 }
 0x126   :  { %2356 = vmatmul.bf16.vlgmr.msra.gmra.mxu1 %v2071_v27 }
 0x127   :  { %2381 = vmatpush.bf16.msra.mxu3 %v3910_v12 }
 0x12a   :  { %v1875_v9 = vpop.f32.mrf.mxu2  ;;  %v1849_v46 = vpop.f32.mrf.mxu0 }
 0x12b   :  { %v1889_v42 = vpop.f32.mrf.mxu3  ;;  %v1863_v48 = vpop.f32.mrf.mxu1  ;;  %v1850_v43 = vadd.f32 %v1849_v46, %v288_v38  ;;  %v1876_v44 = vadd.f32 %v1875_v9, %v1862_v50  ;;  %2382 = vmatpush.bf16.msra.mxu3 %v3909_v15 }
 0x12d   :  { %v1864_v14 = vadd.f32 %v1863_v48, %v1850_v43  ;;  %v1890_v47 = vadd.f32 %v1889_v42, %v1876_v44 }
 0x12f   :  { %2383 = vmatpush.bf16.msra.mxu3 %v3908_v17 }
 0x132   :  { %v1877_v30 = vpop.f32.mrf.mxu2 }
 0x133   :  { %v1891_v1 = vpop.f32.mrf.mxu3  ;;  %v1878_v53 = vadd.f32 %v1877_v30, %v1864_v14 }
 0x135   :  { %v1892_v32 = vadd.f32 %v1891_v1, %v1878_v53  ;;  %v3916_v53 = vld [vmem:[%s5753_s4] ss:$0 sm:$0xff] }
 0x142   :  { %v1903_v51 = vpop.f32.mrf.mxu0 }
 0x143   :  { %v1917_v52 = vpop.f32.mrf.mxu1  ;;  %v1904_v54 = vadd.f32 %v1903_v51, %v1890_v47 }
 0x145   :  { %v1918_v18 = vadd.f32 %v1917_v52, %v1904_v54 }
 0x14a   :  { %v1931_v55 = vpop.f32.mrf.mxu2  ;;  %v1905_v58 = vpop.f32.mrf.mxu0 }
 0x14b   :  { %v1945_v10 = vpop.f32.mrf.mxu3  ;;  %v1906_v56 = vadd.f32 %v1905_v58, %v1892_v32  ;;  %v1919_v57 = vpop.f32.mrf.mxu1  ;;  %v1932_v59 = vadd.f32 %v1931_v55, %v1918_v18 }
 0x14d   :  { %v1920_v28 = vadd.f32 %v1919_v57, %v1906_v56  ;;  %v1946_v62 = vadd.f32 %v1945_v10, %v1932_v59 }
 0x14f   :  { %v2064_v8 = vmax.f32 %v1946_v62, 0.0 }
 0x152   :  { %v1933_v61 = vpop.f32.mrf.mxu2 }
 0x153   :  { %v1934_v63 = vadd.f32 %v1933_v61, %v1920_v28  ;;  %v1947_v2 = vpop.f32.mrf.mxu3 }
 0x155   :  { %v1948_v33 = vadd.f32 %v1947_v2, %v1934_v63 }
 0x157   :  { %v2068_v5 = vmax.f32 %v1948_v33, 0.0 }
 0x159   :  { %v2072_v6 = vpack.c.bf16 %v2068_v5, %v2064_v8 }
 0x15b   :  { %2370 = vmatmul.bf16.vlgmr.msra.gmra.mxu2 %v2072_v6 }
 0x162   :  { %v1959_v13 = vpop.f32.mrf.mxu0 }
 0x163   :  { %v1973_v16 = vpop.f32.mrf.mxu1  ;;  %v1960_v22 = vadd.f32 %v1959_v13, %v289_v19 }
 0x165   :  { %v1974_v24 = vadd.f32 %v1973_v16, %v1960_v22 }
 0x16a   :  { %v1987_v20 = vpop.f32.mrf.mxu2  ;;  %v1961_v40 = vpop.f32.mrf.mxu0 }
 0x16b   :  { %v2001_v21 = vpop.f32.mrf.mxu3  ;;  %v1975_v23 = vpop.f32.mrf.mxu1  ;;  %v1962_v25 = vadd.f32 %v1961_v40, %v289_v19  ;;  %v1988_v60 = vadd.f32 %v1987_v20, %v1974_v24 }
 0x16d   :  { %v1976_v27 = vadd.f32 %v1975_v23, %v1962_v25  ;;  %v2002_v31 = vadd.f32 %v2001_v21, %v1988_v60 }
 0x172   :  { %v1989_v26 = vpop.f32.mrf.mxu2 }
 0x173   :  { %v2003_v3 = vpop.f32.mrf.mxu3  ;;  %v1990_v36 = vadd.f32 %v1989_v26, %v1976_v27 }
 0x175   :  { %v2004_v38 = vadd.f32 %v2003_v3, %v1990_v36 }
 0x182   :  { %v2015_v45 = vpop.f32.mrf.mxu0 }
 0x183   :  { %v2029_v29 = vpop.f32.mrf.mxu1  ;;  %v2016_v34 = vadd.f32 %v2015_v45, %v2002_v31 }
 0x185   :  { %v2030_v49 = vadd.f32 %v2029_v29, %v2016_v34 }
 0x18a   :  { %v2043_v35 = vpop.f32.mrf.mxu2  ;;  %v2017_v9 = vpop.f32.mrf.mxu0 }
 0x18b   :  { %v2057_v41 = vpop.f32.mrf.mxu3  ;;  %v2018_v42 = vadd.f32 %v2017_v9, %v2004_v38  ;;  %v2044_v39 = vadd.f32 %v2043_v35, %v2030_v49  ;;  %v2031_v46 = vpop.f32.mrf.mxu1 }
 0x18d   :  { %v2032_v48 = vadd.f32 %v2031_v46, %v2018_v42  ;;  %v2058_v43 = vadd.f32 %v2057_v41, %v2044_v39 }
 0x18f   :  { %v2065_v1 = vmax.f32 %v2058_v43, 0.0 }
 0x192   :  { %v2045_v50 = vpop.f32.mrf.mxu2 }
 0x193   :  { %v2046_v44 = vadd.f32 %v2045_v50, %v2032_v48  ;;  %v2059_v30 = vpop.f32.mrf.mxu3 }
 0x195   :  { %v2060_v14 = vadd.f32 %v2059_v30, %v2046_v44 }
 0x197   :  { %v2069_v47 = vmax.f32 %v2060_v14, 0.0 }
 0x199   :  { %v2073_v51 = vpack.c.bf16 %v2069_v47, %v2065_v1 }
 0x19b   :  { %2384 = vmatmul.bf16.vlgmr.msra.gmra.mxu3 %v2073_v51 }
 0x1a2   :  { %v2343_v52 = vpop.f32.mrf.mxu0 }
 0x1a3   :  { %v2357_v54 = vpop.f32.mrf.mxu1  ;;  %v2344_v32 = vadd.f32 %v3916_v53, %v2343_v52 }
 0x1a5   :  { %v2358_v18 = vadd.f32 %v2357_v54, %v2344_v32 }
 0x1aa   :  { %v2345_v58 = vpop.f32.mrf.mxu0 }
 0x1ab   :  { %v2346_v57 = vadd.f32 %v3916_v53, %v2345_v58  ;;  %v2359_v28 = vpop.f32.mrf.mxu1 }
 0x1ad   :  { %v2360_v62 = vadd.f32 %v2359_v28, %v2346_v57 }
 0x1de   :  { %v2371_v55 = vpop.f32.mrf.mxu2 }
 0x1df   :  { %v2372_v10 = vadd.f32 %v2371_v55, %v2358_v18 }
 0x1e6   :  { %v2373_v0 = vpop.f32.mrf.mxu2 }
 0x1e7   :  { %v2374_v63 = vadd.f32 %v2373_v0, %v2360_v62 }
 0x21e   :  { %v2385_v56 = vpop.f32.mrf.mxu3 }
 0x21f   :  { %v2386_v59 = vadd.f32 %v2385_v56, %v2372_v10 }
 0x221   :  { %v3618_v61 = vmul.f32 -1.442695, %v2386_v59 }
 0x223   :  { %3917 = vpow2.f32 %v3618_v61 }
 0x226   :  { %v2387_v2 = vpop.f32.mrf.mxu3 }
 0x227   :  { %v2388_v4 = vadd.f32 %v2387_v2, %v2374_v63 }
 0x229   :  { %v3918_v33 = vpop.eup %3917  ;;  %v3619_v8 = vmul.f32 -1.442695, %v2388_v4 }
 0x22a   :  { %v2396_v5 = vadd.f32 1.0, %v3918_v33 }
 0x22b   :  { %3919 = vpow2.f32 %v3619_v8 }
 0x22c   :  { %3921 = vrcp.f32 %v2396_v5  ;;  %v2409_v13 = vand.u32 2147483648, %v2396_v5  ;;  %v2407_v16 = vand.u32 2147483647, %v2396_v5  ;;  %vm2403_vm1 = vweird.f32 %v2396_v5 }
 0x22e   :  { %v2410_v20 = vor.u32 1.1754944e-38, %v2409_v13  ;;  %vm2408_vm3 = vcmp.eq.f32.partialorder %v2407_v16, 8.507059e+37 }
 0x231   :  { %v3920_v6 = vpop.eup %3919 }
 0x232   :  { %v3922_v7 = vpop.eup %3921  ;;  %v2397_v37 = vadd.f32 1.0, %v3920_v6 }
 0x233   :  { %v2399_v11 = vmul.f32 %v3922_v7, %v2396_v5  ;;  %vm2404_vm0 = vweird.f32 %v3922_v7 }
 0x234   :  { %3923 = vrcp.f32 %v2397_v37  ;;  %vm2405_vm2 = vmor %vm2403_vm1, %vm2404_vm0  ;;  %v2424_v24 = vand.u32 2147483648, %v2397_v37  ;;  %v2422_v26 = vand.u32 2147483647, %v2397_v37  ;;  %vm2418_vm5 = vweird.f32 %v2397_v37 }
 0x235   :  { %v2400_v12 = vsub.f32 1.0, %v2399_v11 }
 0x236   :  { %v2425_v27 = vor.u32 1.1754944e-38, %v2424_v24  ;;  %vm2423_vm7 = vcmp.eq.f32.partialorder %v2422_v26, 8.507059e+37 }
 0x237   :  { %v2401_v15 = vmul.f32 %v3922_v7, %v2400_v12 }
 0x239   :  { %v2402_v19 = vadd.f32 %v3922_v7, %v2401_v15 }
 0x23a   :  { %v3924_v17 = vpop.eup %3923 }
 0x23b   :  { %v2406_v21 = vsel %vm2405_vm2, %v3922_v7, %v2402_v19  ;;  %v2414_v22 = vmul.f32 %v3924_v17, %v2397_v37  ;;  %vm2419_vm4 = vweird.f32 %v3924_v17 }
 0x23c   :  { %v2411_v40 = vsel %vm2408_vm3, %v2410_v20, %v2406_v21  ;;  %vm2420_vm6 = vmor %vm2418_vm5, %vm2419_vm4 }
 0x23d   :  { %2428 = vst [vmem:[%s5754_s5] sm:$0xff] %v2411_v40  ;;  %v2415_v23 = vsub.f32 1.0, %v2414_v22 }
 0x23f   :  { %v2416_v25 = vmul.f32 %v3924_v17, %v2415_v23 }
 0x241   :  { %v2417_v60 = vadd.f32 %v3924_v17, %v2416_v25 }
 0x243   :  { %v2421_v3 = vsel %vm2420_vm6, %v3924_v17, %v2417_v60 }
 0x244   :  { %v2426_v45 = vsel %vm2423_vm7, %v2425_v27, %v2421_v3 }
 0x245   :  { %2429 = vst [vmem:[%s5754_s5 + $0x8] sm:$0xff] %v2426_v45 }

</bundles_post_ra>
